<compile_context>
chip_gen: v6e
topology: v6e:2x2x1
jax: 0.10.0
libtpu: 0.0.40
codegen_flags: <defaults>
</compile_context>

<pallas_src>
import functools
import re

import jax
import jax.numpy as jnp
from jax.experimental import pallas as pl
from jax.experimental.pallas import tpu as pltpu


# --------------------------------------------------------------------------- config

def _tpu_generation():
    """Best-effort TPU generation from device_kind ('TPU v5 lite' -> 5, 'TPU v6e' -> 6)."""
    try:
        kind = jax.devices()[0].device_kind.lower()
        m = re.search(r"(\d+)", kind)
        if m:
            return int(m.group(1))
    except Exception:
        pass
    return 0


def _tpu_compute_config():
    """Generation-aware knobs: (use_bf16, core_parallel, vmem_limit_bytes)."""
    gen = _tpu_generation()
    # bf16 weight construction + matmul operands pay on v6e/v7x (bf16 VPU, native MXU
    # rate, half the vreg/VMEM per (HW, TQ) temporary); v5e has no bf16 VPU -> keep f32.
    use_bf16 = gen >= 6
    # v7x has two TensorCores per chip: shard the batch grid axis across them.
    core_parallel = gen >= 7
    # Physical VMEM: 128 MiB on v5e/v6e, 64 MiB on v7x.  Budget ~3/4 of it (96 / 48 MiB)
    # instead of a fixed 32 MiB; the rest is headroom for compiler scratch / regalloc.
    phys = None
    try:
        phys = getattr(pltpu.get_tpu_info(), "vmem_capacity_bytes", None)
    except Exception:
        phys = None
    if not phys:
        phys = (128 if gen in (5, 6) else 64) * 1024 * 1024   # unknown gen: conservative
    vmem_limit = int(phys) * 3 // 4
    return use_bf16, core_parallel, vmem_limit


def _vmem_estimate_bytes(C, HW, TQ, wbytes):
    io = 2 * (2 * C * HW * 4 + 4 * HW * 4)     # Pallas-double-buffered f32 in/out blocks
    resident = 2 * C * HW * wbytes             # warped scratch + feat cast to compute dtype
    transient = HW * TQ * (2 * 4 + wbytes)     # p / d iota-delta (i32) + (HW, TQ) weight tile
    vectors = 32 * TQ * 4                      # per-tile (1, TQ) coordinate / weight vectors
    return io + resident + transient + vectors


def _pick_q_tile(C, HW, wbytes, vmem_limit):
    """Largest output-pixel tile (multiple of 128, dividing HW) whose working set fits."""
    cands = []
    for t in (HW, 2048, 1024, 512, 256, 128):
        if t <= HW and HW % t == 0 and (t % 128 == 0 or t == HW) and t not in cands:
            cands.append(t)
    for tq in cands:
        if _vmem_estimate_bytes(C, HW, tq, wbytes) <= vmem_limit:
            return tq
    # TODO(synk): input-pixel tiling / separable (row x column) weight factorization for
    # BEV maps where even a 128-lane output tile does not fit.
    raise ValueError(
        f"C={C}, H*W={HW}: even the smallest output-pixel tile does not fit in "
        f"{vmem_limit} bytes of VMEM; this needs input-pixel tiling or the separable "
        "sampler factorization.")


# --------------------------------------------------------------------------- kernel

def _fused_two_stage_sample_kernel(feat_ref, grid_ref, out_ref, warped_ref, *,
                                   H, W, TQ, wdtype):
    """One batch sample per grid step; output pixels processed in TQ-wide lane tiles.

    feat_ref   : (C, H*W) f32    k==1 cav feature, pixels row-major (p = i*W + j)
    grid_ref   : (4, H*W) f32    rows 0,1: affine-warp grid; rows 2,3: flow-warp grid
    out_ref    : (C, H*W) f32    flow-resampled, affine-warped feature
    warped_ref : (C, H*W) wdtype VMEM scratch: stage-1 result (never leaves the chip)
    """
    HW = H * W
    nq = HW // TQ

    # Input-pixel index along the weight-tile rows; shared by both stages and all tiles.
    # Kept int32: Mosaic 16-bit iota support is not relied on (an int16 variant would
    # only halve this one transient).
    p = jax.lax.broadcasted_iota(jnp.int32, (HW, TQ), 0)

    def sample_tile(src, gx, gy):
        # torch grid_sample: mode='bilinear', padding_mode='zeros', align_corners=False.
        # Coordinate math stays f32 on cheap (1, TQ) vectors; only the (HW, TQ) weight
        # tile and the matmul operands use `wdtype`.
        x = ((gx + 1.0) * W - 1.0) * 0.5                     # (1, TQ)
        y = ((gy + 1.0) * H - 1.0) * 0.5
        x0f = jnp.floor(x)
        y0f = jnp.floor(y)
        wx1 = x - x0f
        wx0 = 1.0 - wx1
        wy1 = y - y0f
        wy0 = 1.0 - wy1
        x0 = x0f.astype(jnp.int32)
        y0 = y0f.astype(jnp.int32)
        x1 = x0 + 1
        y1 = y0 + 1
        # zeros padding: out-of-bounds corners get zero weight (cheap (1, TQ) ops)
        vx0 = (x0 >= 0) & (x0 < W)
        vx1 = (x1 >= 0) & (x1 < W)
        vy0 = (y0 >= 0) & (y0 < H)
        vy1 = (y1 >= 0) & (y1 < H)
        w00 = jnp.where(vx0 & vy0, wx0 * wy0, 0.0).astype(wdtype)
        w01 = jnp.where(vx1 & vy0, wx1 * wy0, 0.0).astype(wdtype)
        w10 = jnp.where(vx0 & vy1, wx0 * wy1, 0.0).astype(wdtype)
        w11 = jnp.where(vx1 & vy1, wx1 * wy1, 0.0).astype(wdtype)

        # Delta-index trick: one (HW, TQ) subtract against the UNCLIPPED base index,
        # then a single nested select chain against the constant corner offsets
        # {0, 1, W, W+1}.  Invalid corners already carry zero weight, so a raw-offset
        # row-wrap (e.g. x1 == W) deposits 0 on the aliased pixel -> still correct.
        base = y0 * W + x0                                   # (1, TQ) int32, UNCLIPPED
        d = p - base                                         # (HW, TQ) int32
        zero = jnp.zeros((), wdtype)
        wmat = jnp.where(d == 0, w00,
               jnp.where(d == 1, w01,
               jnp.where(d == W, w10,
               jnp.where(d == W + 1, w11, zero))))           # (HW, TQ) wdtype

        # TODO(synk): for small channel counts (C < ~32) a direct 4-corner gather would
        # beat this matmul-gather (MXU row utilization is only C/256); for very large
        # maps the separable row/column factorization drops weight work to O((H+W)*HW).
        return jnp.dot(src, wmat, preferred_element_type=jnp.float32)   # (C, TQ) f32

    feat = feat_ref[...].astype(wdtype)                      # (C, HW), cast once

    # stage 1: affine-warp the k==1 cav feature into the on-chip scratch
    # (static unroll: nq stays small at these shapes; a fori_loop with dynamic lane
    #  offsets would bound code size for very large nq).
    for qt in range(nq):
        lo, hi = qt * TQ, (qt + 1) * TQ
        warped_ref[:, lo:hi] = sample_tile(
            feat, grid_ref[0:1, lo:hi], grid_ref[1:2, lo:hi]).astype(wdtype)

    # stage 2: flow-displaced re-sample of the warped feature (fused: no HBM round trip)
    warped = warped_ref[...]
    for qt in range(nq):
        lo, hi = qt * TQ, (qt + 1) * TQ
        out_ref[:, lo:hi] = sample_tile(
            warped, grid_ref[2:3, lo:hi], grid_ref[3:4, lo:hi]).astype(out_ref.dtype)


def fused_affine_flow_sample(feat_flat, grids, H, W, *, use_bf16=None, q_tile=None):
    """Fused (affine-warp then flow-warp) bilinear sampler as one pallas_call.

    feat_flat: (B, C, H*W) float32 -- the k==1 cav feature of each batch sample
    grids:     (B, 4, H*W) float32 -- packed normalized sampling grids
    returns    (B, C, H*W) float32
    """
    B, C, HW = feat_flat.shape
    assert HW == H * W

    cfg_bf16, core_parallel, vmem_limit = _tpu_compute_config()
    if use_bf16 is None:
        use_bf16 = cfg_bf16
    wdtype = jnp.bfloat16 if use_bf16 else jnp.float32
    wbytes = 2 if use_bf16 else 4
    TQ = q_tile if q_tile is not None else _pick_q_tile(C, HW, wbytes, vmem_limit)
    assert HW % TQ == 0

    kernel = functools.partial(_fused_two_stage_sample_kernel,
                               H=H, W=W, TQ=TQ, wdtype=wdtype)
    # Advisory hint so XLA schedules neighbours sensibly around a compute-heavy custom
    # call with tiny I/O: two sampling stages of 2*C*HW^2 MACs per batch sample.
    cost = pl.CostEstimate(flops=4 * B * C * HW * HW,
                           transcendentals=0,
                           bytes_accessed=4 * B * (2 * C + 4) * HW)
    dim_sem = (pltpu.CORE_PARALLEL if core_parallel else "parallel",)

    return pl.pallas_call(
        kernel,
        grid=(B,),
        in_specs=[
            pl.BlockSpec((None, C, HW), lambda b: (b, 0, 0)),   # rank-2 (C, HW) ref
            pl.BlockSpec((None, 4, HW), lambda b: (b, 0, 0)),   # rank-2 (4, HW) ref
        ],
        out_specs=pl.BlockSpec((None, C, HW), lambda b: (b, 0, 0)),
        out_shape=jax.ShapeDtypeStruct((B, C, HW), jnp.float32),
        scratch_shapes=[pltpu.VMEM((C, HW), wdtype)],           # stage-1 intermediate
        compiler_params=pltpu.CompilerParams(
            dimension_semantics=dim_sem,
            vmem_limit_bytes=vmem_limit,
        ),
        cost_estimate=cost,
    )(feat_flat, grids)


# --------------------------------------------------------------------------- reference

def _grid_sample_ref_flat(feat_flat, gx, gy, H, W, compute_dtype=jnp.float32):
    """Plain-JAX bilinear grid_sample (zeros padding, align_corners=False) with the
    feature / weight values quantized to `compute_dtype`, mirroring the kernel path.
    feat_flat: (B, C, HW); gx, gy: (B, HW)."""
    B, C, HW = feat_flat.shape
    feat = feat_flat.astype(compute_dtype).astype(jnp.float32)
    x = ((gx + 1.0) * W - 1.0) * 0.5
    y = ((gy + 1.0) * H - 1.0) * 0.5
    x0f = jnp.floor(x)
    y0f = jnp.floor(y)
    wx1 = x - x0f
    wx0 = 1.0 - wx1
    wy1 = y - y0f
    wy0 = 1.0 - wy1
    x0 = x0f.astype(jnp.int32)
    y0 = y0f.astype(jnp.int32)
    x1 = x0 + 1
    y1 = y0 + 1

    def corner(xi, yi, w):
        valid = (xi >= 0) & (xi < W) & (yi >= 0) & (yi < H)
        idx = jnp.clip(yi, 0, H - 1) * W + jnp.clip(xi, 0, W - 1)
        gathered = jnp.take_along_axis(
            feat, jnp.broadcast_to(idx[:, None, :], (B, C, HW)), axis=2)
        wq = jnp.where(valid, w, 0.0).astype(compute_dtype).astype(jnp.float32)
        return gathered * wq[:, None, :]

    return (corner(x0, y0, wx0 * wy0) + corner(x1, y0, wx1 * wy0)
            + corner(x0, y1, wx0 * wy1) + corner(x1, y1, wx1 * wy1))


# --------------------------------------------------------------------------- module

class TemporalFusionPallas:
    """JAX/Pallas port of TemporalFusion.forward (dcn disabled)."""

    def __init__(self, args):
        self.discrete_ratio = float(args['voxel_size'][0])
        self.downsample_rate = float(args['downsample_rate'])
        self.flow_thre = args['flow_thre']
        # STPN / MotionPrediction / StateEstimation are built in the torch __init__ but
        # never called in forward(); they carry no compute here.
        # TODO(synk): optional DCNNet ('dcn' in args) deformable-conv branch not implemented.

    def _prepare(self, x, record_len, pairwise_t_matrix, flow):
        """Plain-JAX glue: t-matrix normalization, k==1 slice, packed sampling grids."""
        S, C, H, W = x.shape
        B = pairwise_t_matrix.shape[0]
        K = S // B          # uniform n_cav per batch (the reference torch.cat needs it too)
        HW = H * W

        # ---- normalize the pairwise transforms exactly as the reference does ----
        t = pairwise_t_matrix[:, :, :, 0:2, :]                    # (B, L, L, 2, 4)
        t = t[..., jnp.array([0, 1, 3])]                          # (B, L, L, 2, 3)
        scale = jnp.array(
            [[1.0, H / W, 2.0 / (self.downsample_rate * self.discrete_ratio * W)],
             [W / H, 1.0, 2.0 / (self.downsample_rate * self.discrete_ratio * H)]],
            dtype=jnp.float32)
        t = t.astype(jnp.float32) * scale

        # Only the k==1 cav of each batch reaches the returned output (the reference
        # warps all K and then takes batch_feat_seqs[:, 1]) -> warp just it.
        feat_k1 = x.reshape(B, K, C, H, W)[:, 1].reshape(B, C, HW).astype(jnp.float32)
        theta = t[:, 0, 1]                                        # (B, 2, 3): cav 1 -> ego

        # ---- affine_grid base coords (align_corners=False), row-major q = i*W + j ----
        xs = (2.0 * jnp.arange(W, dtype=jnp.float32) + 1.0) / W - 1.0
        ys = (2.0 * jnp.arange(H, dtype=jnp.float32) + 1.0) / H - 1.0
        Xb, Yb = jnp.meshgrid(xs, ys)                             # (H, W) each
        Xb = Xb.reshape(1, HW)
        Yb = Yb.reshape(1, HW)
        agx = theta[:, 0, 0:1] * Xb + theta[:, 0, 1:2] * Yb + theta[:, 0, 2:3]   # (B, HW)
        agy = theta[:, 1, 0:1] * Xb + theta[:, 1, 1:2] * Yb + theta[:, 1, 2:3]

        # ---- flow-displaced grid, normalized exactly like the reference (no half-pixel
        # term: (j - flow)/(W/2) - 1 mirrors the torch code verbatim) ----
        flow = flow.astype(jnp.float32)                           # (B, 2, H, W)
        jj = jnp.arange(W, dtype=jnp.float32).reshape(1, 1, W)
        ii = jnp.arange(H, dtype=jnp.float32).reshape(1, H, 1)
        fgx = ((jj - flow[:, 0]) / (W / 2.0) - 1.0).reshape(B, HW)
        fgy = ((ii - flow[:, 1]) / (H / 2.0) - 1.0).reshape(B, HW)

        # one packed, lane-dense grid input (4 rows) instead of two sublane-sparse inputs
        grids = jnp.stack([agx, agy, fgx, fgy], axis=1)           # (B, 4, HW)
        return feat_k1, grids

    def __call__(self, x, record_len, pairwise_t_matrix, data_dict):
        _, C, H, W = x.shape
        B = pairwise_t_matrix.shape[0]
        flow = data_dict['flow_gt']
        feat_k1, grids = self._prepare(x, record_len, pairwise_t_matrix, flow)
        out = fused_affine_flow_sample(feat_k1, grids, H, W).reshape(B, C, H, W)
        return flow, None, out


def _make_pairwise_t_matrix(key, B, L):
    k1, k2, k3 = jax.random.split(key, 3)
    ang = (jax.random.uniform(k1, (B, L, L)) - 0.5) * 0.2
    tx = (jax.random.uniform(k2, (B, L, L)) - 0.5) * 4.0
    ty = (jax.random.uniform(k3, (B, L, L)) - 0.5) * 4.0
    c, s = jnp.cos(ang), jnp.sin(ang)
    T = jnp.zeros((B, L, L, 4, 4), dtype=jnp.float32)
    T = T.at[..., 0, 0].set(c)
    T = T.at[..., 0, 1].set(-s)
    T = T.at[..., 1, 0].set(s)
    T = T.at[..., 1, 1].set(c)
    T = T.at[..., 2, 2].set(1.0)
    T = T.at[..., 3, 3].set(1.0)
    T = T.at[..., 0, 3].set(tx)
    T = T.at[..., 1, 3].set(ty)
    return T


if __name__ == "__main__":
    key = jax.random.PRNGKey(0)
    B, L, K, C, H, W = 2, 2, 2, 4, 16, 16

    k_x, k_t, k_f = jax.random.split(key, 3)
    x = jax.random.normal(k_x, (B * K, C, H, W), dtype=jnp.float32)
    record_len = jnp.array([K] * B, dtype=jnp.int32)
    pairwise_t_matrix = _make_pairwise_t_matrix(k_t, B, L)
    flow_gt = jax.random.normal(k_f, (B, 2, H, W), dtype=jnp.float32) * 1.5

    args = {
        'voxel_size': [0.4, 0.4, 4.0],
        'downsample_rate': 2,
        'channel_size': C,
        'flow_thre': 0.5,
    }
    model = TemporalFusionPallas(args)

    flow_out, _none, out = model(x, record_len, pairwise_t_matrix, {'flow_gt': flow_gt})
    jax.block_until_ready(out)
    assert out.shape == (B, C, H, W), out.shape
    assert flow_out.shape == (B, 2, H, W), flow_out.shape

    # numerical self-check: Pallas fused sampler vs a plain-JAX (XLA) bilinear sampler
    # quantized to the same compute dtype as the kernel path on this TPU generation.
    use_bf16, _, _ = _tpu_compute_config()
    wdtype = jnp.bfloat16 if use_bf16 else jnp.float32
    feat_k1, grids = model._prepare(x, record_len, pairwise_t_matrix, flow_gt)
    warped_ref = _grid_sample_ref_flat(feat_k1, grids[:, 0], grids[:, 1], H, W, wdtype)
    warped_ref = warped_ref.astype(wdtype).astype(jnp.float32)   # mirrors the VMEM scratch dtype
    out_ref = _grid_sample_ref_flat(warped_ref, grids[:, 2], grids[:, 3], H, W, wdtype)
    max_err = float(jnp.max(jnp.abs(out.reshape(B, C, H * W) - out_ref)))
    # both paths quantize identically, so the remaining delta is MXU pass/accumulation
    # order; 5e-2 is a safe ceiling for two chained samplers in either dtype.
    assert max_err < 5e-2, f"Pallas vs JAX reference mismatch: max abs err {max_err}"

    print("KERNEL_OK")
</pallas_src>

<mosaic_0001>
module attributes {stable_mosaic.version = 11 : i64} {
  func.func @_fused_two_stage_sample_kernel(%arg0: i32, %arg1: memref<1x4x256xf32, #tpu.memory_space<vmem>>, %arg2: memref<1x4x256xf32, #tpu.memory_space<vmem>>, %arg3: memref<1x4x256xf32, #tpu.memory_space<vmem>>, %arg4: memref<4x256xf32, #tpu.memory_space<vmem>>) attributes {dimension_semantics = [#tpu.dimension_semantics<parallel>], iteration_bounds = array<i64: 2>, scalar_prefetch = 0 : i64, scratch_operands = 1 : i64, tpu.core_type = #tpu.core_type<tc>, window_params = [{transform_indices = @transform_0, window_bounds = array<i64: 1, 4, 256>}, {transform_indices = @transform_1, window_bounds = array<i64: 1, 4, 256>}, {transform_indices = @transform_2, window_bounds = array<i64: 1, 4, 256>}]} {
    %0 = tpu.iota {dimensions = array<i32: 0>} : vector<256x256xi32>
    %c0 = arith.constant 0 : index
    %c0_0 = arith.constant 0 : index
    %c0_1 = arith.constant 0 : index
    %1 = vector.load %arg1[%c0, %c0_0, %c0_1] : memref<1x4x256xf32, #tpu.memory_space<vmem>>, vector<1x4x256xf32>
    %2 = vector.shape_cast %1 : vector<1x4x256xf32> to vector<4x256xf32>
    %c0_2 = arith.constant 0 : index
    %c0_3 = arith.constant 0 : index
    %c0_4 = arith.constant 0 : index
    %3 = vector.load %arg2[%c0_2, %c0_3, %c0_4] : memref<1x4x256xf32, #tpu.memory_space<vmem>>, vector<1x1x256xf32>
    %4 = vector.shape_cast %3 : vector<1x1x256xf32> to vector<1x256xf32>
    %c0_5 = arith.constant 0 : index
    %c1 = arith.constant 1 : index
    %c0_6 = arith.constant 0 : index
    %5 = vector.load %arg2[%c0_5, %c1, %c0_6] : memref<1x4x256xf32, #tpu.memory_space<vmem>>, vector<1x1x256xf32>
    %6 = vector.shape_cast %5 : vector<1x1x256xf32> to vector<1x256xf32>
    %cst = arith.constant 1.000000e+00 : f32
    %7 = vector.broadcast %cst : f32 to vector<1x256xf32>
    %8 = arith.addf %4, %7 : vector<1x256xf32>
    %cst_7 = arith.constant 1.600000e+01 : f32
    %9 = vector.broadcast %cst_7 : f32 to vector<1x256xf32>
    %10 = arith.mulf %8, %9 : vector<1x256xf32>
    %cst_8 = arith.constant 1.000000e+00 : f32
    %11 = vector.broadcast %cst_8 : f32 to vector<1x256xf32>
    %12 = arith.subf %10, %11 : vector<1x256xf32>
    %cst_9 = arith.constant 5.000000e-01 : f32
    %13 = vector.broadcast %cst_9 : f32 to vector<1x256xf32>
    %14 = arith.mulf %12, %13 : vector<1x256xf32>
    %cst_10 = arith.constant 1.000000e+00 : f32
    %15 = vector.broadcast %cst_10 : f32 to vector<1x256xf32>
    %16 = arith.addf %6, %15 : vector<1x256xf32>
    %cst_11 = arith.constant 1.600000e+01 : f32
    %17 = vector.broadcast %cst_11 : f32 to vector<1x256xf32>
    %18 = arith.mulf %16, %17 : vector<1x256xf32>
    %cst_12 = arith.constant 1.000000e+00 : f32
    %19 = vector.broadcast %cst_12 : f32 to vector<1x256xf32>
    %20 = arith.subf %18, %19 : vector<1x256xf32>
    %cst_13 = arith.constant 5.000000e-01 : f32
    %21 = vector.broadcast %cst_13 : f32 to vector<1x256xf32>
    %22 = arith.mulf %20, %21 : vector<1x256xf32>
    %23 = math.floor %14 : vector<1x256xf32>
    %24 = math.floor %22 : vector<1x256xf32>
    %25 = arith.subf %14, %23 : vector<1x256xf32>
    %cst_14 = arith.constant 1.000000e+00 : f32
    %26 = vector.broadcast %cst_14 : f32 to vector<1x256xf32>
    %27 = arith.subf %26, %25 : vector<1x256xf32>
    %28 = arith.subf %22, %24 : vector<1x256xf32>
    %cst_15 = arith.constant 1.000000e+00 : f32
    %29 = vector.broadcast %cst_15 : f32 to vector<1x256xf32>
    %30 = arith.subf %29, %28 : vector<1x256xf32>
    %31 = arith.fptosi %23 : vector<1x256xf32> to vector<1x256xi32>
    %32 = arith.fptosi %24 : vector<1x256xf32> to vector<1x256xi32>
    %c1_i32 = arith.constant 1 : i32
    %33 = vector.broadcast %c1_i32 : i32 to vector<1x256xi32>
    %34 = arith.addi %31, %33 : vector<1x256xi32>
    %c1_i32_16 = arith.constant 1 : i32
    %35 = vector.broadcast %c1_i32_16 : i32 to vector<1x256xi32>
    %36 = arith.addi %32, %35 : vector<1x256xi32>
    %c0_i32 = arith.constant 0 : i32
    %37 = vector.broadcast %c0_i32 : i32 to vector<1x256xi32>
    %38 = arith.cmpi sge, %31, %37 : vector<1x256xi32>
    %c16_i32 = arith.constant 16 : i32
    %39 = vector.broadcast %c16_i32 : i32 to vector<1x256xi32>
    %40 = arith.cmpi slt, %31, %39 : vector<1x256xi32>
    %41 = arith.andi %38, %40 : vector<1x256xi1>
    %c0_i32_17 = arith.constant 0 : i32
    %42 = vector.broadcast %c0_i32_17 : i32 to vector<1x256xi32>
    %43 = arith.cmpi sge, %34, %42 : vector<1x256xi32>
    %c16_i32_18 = arith.constant 16 : i32
    %44 = vector.broadcast %c16_i32_18 : i32 to vector<1x256xi32>
    %45 = arith.cmpi slt, %34, %44 : vector<1x256xi32>
    %46 = arith.andi %43, %45 : vector<1x256xi1>
    %c0_i32_19 = arith.constant 0 : i32
    %47 = vector.broadcast %c0_i32_19 : i32 to vector<1x256xi32>
    %48 = arith.cmpi sge, %32, %47 : vector<1x256xi32>
    %c16_i32_20 = arith.constant 16 : i32
    %49 = vector.broadcast %c16_i32_20 : i32 to vector<1x256xi32>
    %50 = arith.cmpi slt, %32, %49 : vector<1x256xi32>
    %51 = arith.andi %48, %50 : vector<1x256xi1>
    %c0_i32_21 = arith.constant 0 : i32
    %52 = vector.broadcast %c0_i32_21 : i32 to vector<1x256xi32>
    %53 = arith.cmpi sge, %36, %52 : vector<1x256xi32>
    %c16_i32_22 = arith.constant 16 : i32
    %54 = vector.broadcast %c16_i32_22 : i32 to vector<1x256xi32>
    %55 = arith.cmpi slt, %36, %54 : vector<1x256xi32>
    %56 = arith.andi %53, %55 : vector<1x256xi1>
    %57 = arith.andi %41, %51 : vector<1x256xi1>
    %58 = arith.mulf %27, %30 : vector<1x256xf32>
    %cst_23 = arith.constant 0.000000e+00 : f32
    %59 = vector.broadcast %cst_23 : f32 to vector<1x256xf32>
    %60 = arith.select %57, %58, %59 : vector<1x256xi1>, vector<1x256xf32>
    %61 = arith.andi %46, %51 : vector<1x256xi1>
    %62 = arith.mulf %25, %30 : vector<1x256xf32>
    %cst_24 = arith.constant 0.000000e+00 : f32
    %63 = vector.broadcast %cst_24 : f32 to vector<1x256xf32>
    %64 = arith.select %61, %62, %63 : vector<1x256xi1>, vector<1x256xf32>
    %65 = arith.andi %41, %56 : vector<1x256xi1>
    %66 = arith.mulf %27, %28 : vector<1x256xf32>
    %cst_25 = arith.constant 0.000000e+00 : f32
    %67 = vector.broadcast %cst_25 : f32 to vector<1x256xf32>
    %68 = arith.select %65, %66, %67 : vector<1x256xi1>, vector<1x256xf32>
    %69 = arith.andi %46, %56 : vector<1x256xi1>
    %70 = arith.mulf %25, %28 : vector<1x256xf32>
    %cst_26 = arith.constant 0.000000e+00 : f32
    %71 = vector.broadcast %cst_26 : f32 to vector<1x256xf32>
    %72 = arith.select %69, %70, %71 : vector<1x256xi1>, vector<1x256xf32>
    %c16_i32_27 = arith.constant 16 : i32
    %73 = vector.broadcast %c16_i32_27 : i32 to vector<1x256xi32>
    %74 = arith.muli %32, %73 : vector<1x256xi32>
    %75 = arith.addi %74, %31 : vector<1x256xi32>
    %76 = vector.broadcast %75 : vector<1x256xi32> to vector<256x256xi32>
    %77 = arith.subi %0, %76 : vector<256x256xi32>
    %c0_i32_28 = arith.constant 0 : i32
    %78 = vector.broadcast %c0_i32_28 : i32 to vector<256x256xi32>
    %79 = arith.cmpi eq, %77, %78 : vector<256x256xi32>
    %c1_i32_29 = arith.constant 1 : i32
    %80 = vector.broadcast %c1_i32_29 : i32 to vector<256x256xi32>
    %81 = arith.cmpi eq, %77, %80 : vector<256x256xi32>
    %c16_i32_30 = arith.constant 16 : i32
    %82 = vector.broadcast %c16_i32_30 : i32 to vector<256x256xi32>
    %83 = arith.cmpi eq, %77, %82 : vector<256x256xi32>
    %c17_i32 = arith.constant 17 : i32
    %84 = vector.broadcast %c17_i32 : i32 to vector<256x256xi32>
    %85 = arith.cmpi eq, %77, %84 : vector<256x256xi32>
    %cst_31 = arith.constant 0.000000e+00 : f32
    %86 = vector.shape_cast %72 : vector<1x256xf32> to vector<1x256xf32>
    %87 = vector.broadcast %86 : vector<1x256xf32> to vector<256x256xf32>
    %88 = vector.broadcast %cst_31 : f32 to vector<256x256xf32>
    %89 = arith.select %85, %87, %88 : vector<256x256xi1>, vector<256x256xf32>
    %90 = vector.shape_cast %68 : vector<1x256xf32> to vector<1x256xf32>
    %91 = vector.broadcast %90 : vector<1x256xf32> to vector<256x256xf32>
    %92 = arith.select %83, %91, %89 : vector<256x256xi1>, vector<256x256xf32>
    %93 = vector.shape_cast %64 : vector<1x256xf32> to vector<1x256xf32>
    %94 = vector.broadcast %93 : vector<1x256xf32> to vector<256x256xf32>
    %95 = arith.select %81, %94, %92 : vector<256x256xi1>, vector<256x256xf32>
    %96 = vector.shape_cast %60 : vector<1x256xf32> to vector<1x256xf32>
    %97 = vector.broadcast %96 : vector<1x256xf32> to vector<256x256xf32>
    %98 = arith.select %79, %97, %95 : vector<256x256xi1>, vector<256x256xf32>
    %cst_32 = arith.constant dense<0.000000e+00> : vector<4x256xf32>
    %99 = tpu.matmul %2, %98, %cst_32 {dimension_numbers = #tpu.dot_dimension_numbers<[1], [0], [0], [1], [0, 0, 1, 1], [], []>} : vector<4x256xf32>, vector<256x256xf32>, vector<4x256xf32> -> vector<4x256xf32>
    %c0_33 = arith.constant 0 : index
    %c0_34 = arith.constant 0 : index
    %100 = vector.load %arg4[%c0_33, %c0_34] : memref<4x256xf32, #tpu.memory_space<vmem>>, vector<4x256xf32>
    tpu.vector_store %arg4[%c0_33, %c0_34], %99 {strides = array<i32>} : memref<4x256xf32, #tpu.memory_space<vmem>>, vector<4x256xf32>,
    %c0_35 = arith.constant 0 : index
    %c0_36 = arith.constant 0 : index
    %101 = vector.load %arg4[%c0_35, %c0_36] : memref<4x256xf32, #tpu.memory_space<vmem>>, vector<4x256xf32>
    %c0_37 = arith.constant 0 : index
    %c2 = arith.constant 2 : index
    %c0_38 = arith.constant 0 : index
    %102 = vector.load %arg2[%c0_37, %c2, %c0_38] : memref<1x4x256xf32, #tpu.memory_space<vmem>>, vector<1x1x256xf32>
    %103 = vector.shape_cast %102 : vector<1x1x256xf32> to vector<1x256xf32>
    %c0_39 = arith.constant 0 : index
    %c3 = arith.constant 3 : index
    %c0_40 = arith.constant 0 : index
    %104 = vector.load %arg2[%c0_39, %c3, %c0_40] : memref<1x4x256xf32, #tpu.memory_space<vmem>>, vector<1x1x256xf32>
    %105 = vector.shape_cast %104 : vector<1x1x256xf32> to vector<1x256xf32>
    %cst_41 = arith.constant 1.000000e+00 : f32
    %106 = vector.broadcast %cst_41 : f32 to vector<1x256xf32>
    %107 = arith.addf %103, %106 : vector<1x256xf32>
    %cst_42 = arith.constant 1.600000e+01 : f32
    %108 = vector.broadcast %cst_42 : f32 to vector<1x256xf32>
    %109 = arith.mulf %107, %108 : vector<1x256xf32>
    %cst_43 = arith.constant 1.000000e+00 : f32
    %110 = vector.broadcast %cst_43 : f32 to vector<1x256xf32>
    %111 = arith.subf %109, %110 : vector<1x256xf32>
    %cst_44 = arith.constant 5.000000e-01 : f32
    %112 = vector.broadcast %cst_44 : f32 to vector<1x256xf32>
    %113 = arith.mulf %111, %112 : vector<1x256xf32>
    %cst_45 = arith.constant 1.000000e+00 : f32
    %114 = vector.broadcast %cst_45 : f32 to vector<1x256xf32>
    %115 = arith.addf %105, %114 : vector<1x256xf32>
    %cst_46 = arith.constant 1.600000e+01 : f32
    %116 = vector.broadcast %cst_46 : f32 to vector<1x256xf32>
    %117 = arith.mulf %115, %116 : vector<1x256xf32>
    %cst_47 = arith.constant 1.000000e+00 : f32
    %118 = vector.broadcast %cst_47 : f32 to vector<1x256xf32>
    %119 = arith.subf %117, %118 : vector<1x256xf32>
    %cst_48 = arith.constant 5.000000e-01 : f32
    %120 = vector.broadcast %cst_48 : f32 to vector<1x256xf32>
    %121 = arith.mulf %119, %120 : vector<1x256xf32>
    %122 = math.floor %113 : vector<1x256xf32>
    %123 = math.floor %121 : vector<1x256xf32>
    %124 = arith.subf %113, %122 : vector<1x256xf32>
    %cst_49 = arith.constant 1.000000e+00 : f32
    %125 = vector.broadcast %cst_49 : f32 to vector<1x256xf32>
    %126 = arith.subf %125, %124 : vector<1x256xf32>
    %127 = arith.subf %121, %123 : vector<1x256xf32>
    %cst_50 = arith.constant 1.000000e+00 : f32
    %128 = vector.broadcast %cst_50 : f32 to vector<1x256xf32>
    %129 = arith.subf %128, %127 : vector<1x256xf32>
    %130 = arith.fptosi %122 : vector<1x256xf32> to vector<1x256xi32>
    %131 = arith.fptosi %123 : vector<1x256xf32> to vector<1x256xi32>
    %c1_i32_51 = arith.constant 1 : i32
    %132 = vector.broadcast %c1_i32_51 : i32 to vector<1x256xi32>
    %133 = arith.addi %130, %132 : vector<1x256xi32>
    %c1_i32_52 = arith.constant 1 : i32
    %134 = vector.broadcast %c1_i32_52 : i32 to vector<1x256xi32>
    %135 = arith.addi %131, %134 : vector<1x256xi32>
    %c0_i32_53 = arith.constant 0 : i32
    %136 = vector.broadcast %c0_i32_53 : i32 to vector<1x256xi32>
    %137 = arith.cmpi sge, %130, %136 : vector<1x256xi32>
    %c16_i32_54 = arith.constant 16 : i32
    %138 = vector.broadcast %c16_i32_54 : i32 to vector<1x256xi32>
    %139 = arith.cmpi slt, %130, %138 : vector<1x256xi32>
    %140 = arith.andi %137, %139 : vector<1x256xi1>
    %c0_i32_55 = arith.constant 0 : i32
    %141 = vector.broadcast %c0_i32_55 : i32 to vector<1x256xi32>
    %142 = arith.cmpi sge, %133, %141 : vector<1x256xi32>
    %c16_i32_56 = arith.constant 16 : i32
    %143 = vector.broadcast %c16_i32_56 : i32 to vector<1x256xi32>
    %144 = arith.cmpi slt, %133, %143 : vector<1x256xi32>
    %145 = arith.andi %142, %144 : vector<1x256xi1>
    %c0_i32_57 = arith.constant 0 : i32
    %146 = vector.broadcast %c0_i32_57 : i32 to vector<1x256xi32>
    %147 = arith.cmpi sge, %131, %146 : vector<1x256xi32>
    %c16_i32_58 = arith.constant 16 : i32
    %148 = vector.broadcast %c16_i32_58 : i32 to vector<1x256xi32>
    %149 = arith.cmpi slt, %131, %148 : vector<1x256xi32>
    %150 = arith.andi %147, %149 : vector<1x256xi1>
    %c0_i32_59 = arith.constant 0 : i32
    %151 = vector.broadcast %c0_i32_59 : i32 to vector<1x256xi32>
    %152 = arith.cmpi sge, %135, %151 : vector<1x256xi32>
    %c16_i32_60 = arith.constant 16 : i32
    %153 = vector.broadcast %c16_i32_60 : i32 to vector<1x256xi32>
    %154 = arith.cmpi slt, %135, %153 : vector<1x256xi32>
    %155 = arith.andi %152, %154 : vector<1x256xi1>
    %156 = arith.andi %140, %150 : vector<1x256xi1>
    %157 = arith.mulf %126, %129 : vector<1x256xf32>
    %cst_61 = arith.constant 0.000000e+00 : f32
    %158 = vector.broadcast %cst_61 : f32 to vector<1x256xf32>
    %159 = arith.select %156, %157, %158 : vector<1x256xi1>, vector<1x256xf32>
    %160 = arith.andi %145, %150 : vector<1x256xi1>
    %161 = arith.mulf %124, %129 : vector<1x256xf32>
    %cst_62 = arith.constant 0.000000e+00 : f32
    %162 = vector.broadcast %cst_62 : f32 to vector<1x256xf32>
    %163 = arith.select %160, %161, %162 : vector<1x256xi1>, vector<1x256xf32>
    %164 = arith.andi %140, %155 : vector<1x256xi1>
    %165 = arith.mulf %126, %127 : vector<1x256xf32>
    %cst_63 = arith.constant 0.000000e+00 : f32
    %166 = vector.broadcast %cst_63 : f32 to vector<1x256xf32>
    %167 = arith.select %164, %165, %166 : vector<1x256xi1>, vector<1x256xf32>
    %168 = arith.andi %145, %155 : vector<1x256xi1>
    %169 = arith.mulf %124, %127 : vector<1x256xf32>
    %cst_64 = arith.constant 0.000000e+00 : f32
    %170 = vector.broadcast %cst_64 : f32 to vector<1x256xf32>
    %171 = arith.select %168, %169, %170 : vector<1x256xi1>, vector<1x256xf32>
    %c16_i32_65 = arith.constant 16 : i32
    %172 = vector.broadcast %c16_i32_65 : i32 to vector<1x256xi32>
    %173 = arith.muli %131, %172 : vector<1x256xi32>
    %174 = arith.addi %173, %130 : vector<1x256xi32>
    %175 = vector.broadcast %174 : vector<1x256xi32> to vector<256x256xi32>
    %176 = arith.subi %0, %175 : vector<256x256xi32>
    %c0_i32_66 = arith.constant 0 : i32
    %177 = vector.broadcast %c0_i32_66 : i32 to vector<256x256xi32>
    %178 = arith.cmpi eq, %176, %177 : vector<256x256xi32>
    %c1_i32_67 = arith.constant 1 : i32
    %179 = vector.broadcast %c1_i32_67 : i32 to vector<256x256xi32>
    %180 = arith.cmpi eq, %176, %179 : vector<256x256xi32>
    %c16_i32_68 = arith.constant 16 : i32
    %181 = vector.broadcast %c16_i32_68 : i32 to vector<256x256xi32>
    %182 = arith.cmpi eq, %176, %181 : vector<256x256xi32>
    %c17_i32_69 = arith.constant 17 : i32
    %183 = vector.broadcast %c17_i32_69 : i32 to vector<256x256xi32>
    %184 = arith.cmpi eq, %176, %183 : vector<256x256xi32>
    %cst_70 = arith.constant 0.000000e+00 : f32
    %185 = vector.shape_cast %171 : vector<1x256xf32> to vector<1x256xf32>
    %186 = vector.broadcast %185 : vector<1x256xf32> to vector<256x256xf32>
    %187 = vector.broadcast %cst_70 : f32 to vector<256x256xf32>
    %188 = arith.select %184, %186, %187 : vector<256x256xi1>, vector<256x256xf32>
    %189 = vector.shape_cast %167 : vector<1x256xf32> to vector<1x256xf32>
    %190 = vector.broadcast %189 : vector<1x256xf32> to vector<256x256xf32>
    %191 = arith.select %182, %190, %188 : vector<256x256xi1>, vector<256x256xf32>
    %192 = vector.shape_cast %163 : vector<1x256xf32> to vector<1x256xf32>
    %193 = vector.broadcast %192 : vector<1x256xf32> to vector<256x256xf32>
    %194 = arith.select %180, %193, %191 : vector<256x256xi1>, vector<256x256xf32>
    %195 = vector.shape_cast %159 : vector<1x256xf32> to vector<1x256xf32>
    %196 = vector.broadcast %195 : vector<1x256xf32> to vector<256x256xf32>
    %197 = arith.select %178, %196, %194 : vector<256x256xi1>, vector<256x256xf32>
    %cst_71 = arith.constant dense<0.000000e+00> : vector<4x256xf32>
    %198 = tpu.matmul %101, %197, %cst_71 {dimension_numbers = #tpu.dot_dimension_numbers<[1], [0], [0], [1], [0, 0, 1, 1], [], []>} : vector<4x256xf32>, vector<256x256xf32>, vector<4x256xf32> -> vector<4x256xf32>
    %c0_72 = arith.constant 0 : index
    %c0_73 = arith.constant 0 : index
    %c0_74 = arith.constant 0 : index
    %199 = vector.load %arg3[%c0_72, %c0_73, %c0_74] : memref<1x4x256xf32, #tpu.memory_space<vmem>>, vector<1x4x256xf32>
    %200 = vector.shape_cast %199 : vector<1x4x256xf32> to vector<4x256xf32>
    %201 = vector.shape_cast %198 : vector<4x256xf32> to vector<1x4x256xf32>
    tpu.vector_store %arg3[%c0_72, %c0_73, %c0_74], %201 {strides = array<i32>} : memref<1x4x256xf32, #tpu.memory_space<vmem>>, vector<1x4x256xf32>,
    return
  }
  func.func @transform_0(%arg0: i32) -> (i32, i32, i32) {
    %c0_i32 = arith.constant 0 : i32
    %c0_i32_0 = arith.constant 0 : i32
    %c0_i32_1 = arith.constant 0 : i32
    return %arg0, %c0_i32, %c0_i32_0 : i32, i32, i32
  }
  func.func @transform_1(%arg0: i32) -> (i32, i32, i32) {
    %c0_i32 = arith.constant 0 : i32
    %c0_i32_0 = arith.constant 0 : i32
    %c0_i32_1 = arith.constant 0 : i32
    return %arg0, %c0_i32, %c0_i32_0 : i32, i32, i32
  }
  func.func @transform_2(%arg0: i32) -> (i32, i32, i32) {
    %c0_i32 = arith.constant 0 : i32
    %c0_i32_0 = arith.constant 0 : i32
    %c0_i32_1 = arith.constant 0 : i32
    return %arg0, %c0_i32, %c0_i32_0 : i32, i32, i32
  }
}

</mosaic_0001>

<bundles_post_ra>
// kernel: tpu_custom_call.1
= control target key start
LH: loop header
LB: loop body
LE: loop exit
PB: predicated region body
PF: predicated region fallthrough
CT: control target
= control target key end

     0   :  { %7 = vsyncpa [#allocation4], 0  ;;  %s3483_s0 = inlined_call_operand.hbm [shape: f32[2,4,256], index: 0, kind: input, shape index: {}]   ;;  %s3484_s1 = inlined_call_operand.hbm [shape: f32[2,4,256], index: 1, kind: input, shape index: {}]   ;;  %s3485_s2 = inlined_call_operand.hbm [shape: f32[2,4,256], index: 2, kind: output, shape index: {}]  }
   0x1   :  { %9 = vsyncpa [#allocation4 + $0x1], 0 }
   0x2   :  { %10 = vsyncpa [#allocation7], 0 }
   0x3   :  { %12 = vsyncpa [#allocation7 + $0x1], 0 }
   0x4   :  { %13 = vsyncpa [#allocation5], 0 }
   0x5   :  { %15 = vsyncpa [#allocation5 + $0x1], 0  ;;  %s2083_s9 = smov 0   ;;  %s2085_s10 = smov 0  }
   0x6   :  { %s2087_s11 = smov 0   ;;  %s2089_s12 = smov 0  }
   0x7 LB: > { %s2104_s13 = sadd.s32 4294967295, %s2063_s12   ;;  %s1850_s14 = sadd.s32 4294967294, %s2063_s12   ;;  %s2063_s12 = sphi %s2089_s12, %s3520_s12   ;;  %s2059_s11 = sphi %s2087_s11, %s3519_s11   ;;  %s2055_s10 = sphi %s2085_s10, %s3518_s10   ;;  %s2051_s9 = sphi %s2083_s9, %s3517_s9  }
   0x8   : > { %s2108_s15 = sadd.s32 1, %s2063_s12   ;;  %s28_s16 = sadd.s32 1, %s2059_s11 }
   0x9   : > { %s25_s17 = ssub.s32 %s2063_s12, %s2108_s15  ;;  %p35_p0 = scmp.ne.s32.totalorder %s2059_s11, %s2055_s10 }
   0xa   : > { %p26_p1 = scmp.eq.s32.totalorder %s25_s17, 0  ;;  %p36_p2 = scmp.eq.s32.totalorder %s2063_s12, 0 }
   0xb   : > { %p41_p3 = scmp.ne.s32.totalorder %s2055_s10, %s2051_s9  ;;  %p42_p4 = scmp.eq.s32.totalorder %s2104_s13, 0 }
   0xc   : > { %s2120_s18 = scalar_select %p26_p1, %s2059_s11, %s28_s16  }
   0xd   : > { %p2122_p5 = por %p36_p2, %p35_p0  ;;  %p2126_p6 = por %p42_p4, %p41_p3 }
   0xe   : > { %p91_p7 = scmp.eq.s32.totalorder %s2104_s13, 1  ;;  %p97_p8 = scmp.eq.s32.totalorder %s1850_s14, 1 }
   0xf   : > { %s3489_s20 = scalar_select %p2126_p6, 1, 0 }
  0x10   : > { %p1904_p10 = scmp.lt.s32.totalorder %s2063_s12, 2  ;;  %p2133_p11 = por %p91_p7, %p35_p0 }
  0x11   : > { %p2137_p12 = por %p97_p8, %p41_p3  ;;  %s2142_s23 = sand.u32 1, %s2059_s11  }
  0x12   : > { %s3490_s21 = scalar_select %p2133_p11, 1, 0 }
  0x13   : > { %s3491_s22 = scalar_select %p2137_p12, 1, 0 }
  0x14   : > { %s1875_s24 = sshll.u32 %s2063_s12, 7  ;;  %s1853_s25 = sshll.u32 %s2142_s23, 3 }
  0x15   : > { %s2151_s28 = scalar_lea.hbm %s3483_s0, %s1875_s24  ;;  %s121_s29 = scalar_lea.vmem [#allocation3], %s1853_s25 }
  0x16   : > { %s129_s30 = sshll.u32 %s121_s29, 4  ;;  %p2157_p13 = pnand %p1904_p10, %p2122_p5  ;;  %s2161_s30 = int_to_ptr.vmem [resolvable:$true] %s129_s30 }
  0x17   : > { %s118_s4 = scalar_lea.sflag [#allocation4], %s2142_s23  ;;  %s1939_s5 = scalar_lea.hbm %s2151_s28, 128 }
  0x18   : > { %p1940_p2 = scmp.ne.s32.totalorder %s2151_s28, %s1939_s5  ;;  %p1941_p3 = pneg %p2157_p13 }
  0x19   : > { %s1944_s8 = scalar_lea.hbm %s3483_s0, 256  ;;  %p1945_p5 = scmp.lt.s32.totalorder %s2151_s28, %s3483_s0 }
  0x1a   : > { %p1942_p4 = pnand %p1941_p3, %p1940_p2  ;;  %p1946_p8 = scmp.lt.s32.totalorder %s1944_s8, %s1939_s5 }
  0x1c   : > { %p1943_p7 = pneg %p1942_p4  ;;  %p1947_p10 = por %p1946_p8, %p1945_p5 }
  0x1e   : > { %p1948_p9 = pnand %p1947_p10, %p1943_p7 }
  0x20   : > { %1951 = shalt.err (!%p1948_p9)
}
  0x21   : > { %s1952_s17 = scalar_lea.vmem %s2161_s30, 128  ;;  %s2065_s19 = smov [#allocation3]  }
  0x22   : > { %p1953_p0 = scmp.ne.s32.totalorder %s2161_s30, %s1952_s17  ;;  %s1957_s26 = sshll.u32 %s2065_s19, 4  ;;  %s1958_s26 = int_to_ptr.vmem [resolvable:$false] %s1957_s26 }
  0x23   : > { %s1959_s27 = scalar_lea.vmem %s1958_s26, 256  ;;  %p1960_p1 = scmp.lt.s32.totalorder %s2161_s30, %s1958_s26 }
  0x24   : > { %p1955_p2 = pnand %p1953_p0, %p1941_p3  ;;  %p1961_p12 = scmp.lt.s32.totalorder %s1959_s27, %s1952_s17 }
  0x26   : > { %p1956_p4 = pneg %p1955_p2  ;;  %p1962_p11 = por %p1961_p12, %p1960_p1 }
  0x28   : > { %p1963_p5 = pnand %p1962_p11, %p1956_p4 }
  0x2a   : > { %1966 = shalt.err (!%p1963_p5)
}
  0x2b   : > { %1896 = dma.hbm_to_vmem [thread:$0]  (!%p2157_p13), %s2151_s28, 128, %s2161_s30, %s118_s4  }
  0x2c   : > { %p3493_p9 = scmp.lt.s32.totalorder %s2063_s12, 3  ;;  %p3494_p0 = scmp.ge.s32.totalorder %s2063_s12, 1 }
  0x2d   : > { %s2203_s7 = scalar_lea.hbm %s3484_s1, %s1875_s24  ;;  %s140_s8 = scalar_lea.vmem [#allocation6], %s1853_s25 }
  0x2e   : > { %p2194_p7 = pnand %p3494_p0, %p3493_p9  ;;  %s148_s14 = sshll.u32 %s140_s8, 4  ;;  %s149_s14 = int_to_ptr.vmem [resolvable:$true] %s148_s14 }
  0x2f   : > { %s137_s28 = scalar_lea.sflag [#allocation7], %s2142_s23  ;;  %s1967_s30 = scalar_lea.hbm %s2203_s7, 128 }
  0x30   : > { %s3495_s29 = scalar_select %p2194_p7, 1, 0 }
  0x31   : > { %p1968_p11 = scmp.ne.s32.totalorder %s2203_s7, %s1967_s30  ;;  %s1972_s17 = scalar_lea.hbm %s3484_s1, 256 }
  0x32   : > { %p1973_p8 = scmp.lt.s32.totalorder %s2203_s7, %s3484_s1  ;;  %p1974_p10 = scmp.lt.s32.totalorder %s1972_s17, %s1967_s30 }
  0x33   : > { %p1970_p12 = pnand %p1968_p11, %p1941_p3 }
  0x34   : > { %p1975_p2 = por %p1974_p10, %p1973_p8 }
  0x35   : > { %p1971_p1 = pneg %p1970_p12 }
  0x37   : > { %p1976_p4 = pnand %p1975_p2, %p1971_p1 }
  0x39   : > { %1979 = shalt.err (!%p1976_p4)
}
  0x3a   : > { %s1980_s25 = scalar_lea.vmem %s149_s14, 128  ;;  %s2066_s23 = smov [#allocation6]  }
  0x3b   : > { %p1981_p5 = scmp.ne.s32.totalorder %s149_s14, %s1980_s25  ;;  %s1985_s26 = sshll.u32 %s2066_s23, 4  ;;  %s1986_s26 = int_to_ptr.vmem [resolvable:$false] %s1985_s26 }
  0x3c   : > { %s1987_s27 = scalar_lea.vmem %s1986_s26, 256  ;;  %p1988_p11 = scmp.lt.s32.totalorder %s149_s14, %s1986_s26 }
  0x3d   : > { %p1983_p9 = pnand %p1981_p5, %p1941_p3  ;;  %p1989_p12 = scmp.lt.s32.totalorder %s1987_s27, %s1980_s25 }
  0x3f   : > { %p1984_p0 = pneg %p1983_p9  ;;  %p1990_p6 = por %p1989_p12, %p1988_p11 }
  0x41   : > { %p1991_p7 = pnand %p1990_p6, %p1984_p0 }
  0x43   : > { %1994 = shalt.err (!%p1991_p7)
}
  0x44   : > { %1899 = dma.hbm_to_vmem [thread:$0]  (!%p2157_p13), %s2203_s7, 128, %s149_s14, %s137_s28  }
  0x45   : > { %p3496_p1 = scmp.ne.s32.totalorder %s3495_s29, 0 }
  0x46   : > { %s2229_s5 = sand.u32 (!%p3496_p1), 1, %s2055_s10   ;;  %p3497_p6 = scmp.ne.s32.totalorder (!%p3496_p1), %s3489_s20, 0 }
  0x47   : > { %157 = sbr.rel (%p3496_p1) target bundleno = 670 (0x29e), region = 28  ;;  %s2232_s6 = sshll.u32 (!%p3496_p1), %s2229_s5, 3 }
  0x48   : > { %s160_s8 = scalar_lea.sflag (!%p3496_p1), [#allocation4], %s2229_s5  ;;  %s163_s30 = scalar_lea.vmem (!%p3496_p1), [#allocation3], %s2232_s6 }
  0x4c   : > { %2038 = dma.done.wait (%p3497_p6), %s160_s8, 128  }
  0x4d   : > { %2040 = vsyncadd (%p3497_p6), %s160_s8, 4294967168  ;;  %s169_s3 = scalar_lea.sflag [#allocation7], %s2229_s5  ;;  %s172_s29 = scalar_lea.vmem [#allocation6], %s2232_s6 }
  0x4e   : > { %2042 = dma.done.wait (%p3497_p6), %s169_s3, 128  }
  0x4f   : > { %2044 = vsyncadd (%p3497_p6), %s169_s3, 4294967168  ;;  %v198_v0 = vlaneseq  ;;  %v232_v9 = vld [vmem:[%s172_s29] ss:$4 sm:$0x3]  ;;  %s1877_s20 = sshll.u32 %s2104_s13, 7  ;;  %s197_s7 = scalar_lea.vmem [#allocation8], %s2232_s6 }
  0x50   : > { %v1863_v10 = vld [vmem:[%s172_s29 + $0x1] ss:$4 sm:$0x3]  ;;  %v235_v11 = vadd.f32 1.0, %v232_v9  ;;  %s1757_s14 = sshll.u32 %s197_s7, 4  ;;  %s1755_s16 = scalar_lea.hbm %s3485_s2, %s1877_s20  ;;  %s1758_s14 = int_to_ptr.vmem [resolvable:$true] %s1757_s14 }
  0x51   : > { %v2246_v1 = vshrl.u32 %v198_v0, 7  ;;  %v239_v12 = vadd.f32 1.0, %v1863_v10  ;;  %v1866_v13 = vld [vmem:[%s172_s29 + $0x2] ss:$4 sm:$0x3]  ;;  %s1743_s17 = scalar_lea.sflag [#allocation5], %s2229_s5 }
  0x52   : > { %v1867_v15 = vld [vmem:[%s172_s29 + $0x3] ss:$4 sm:$0x3]  ;;  %v991_v16 = vadd.f32 1.0, %v1866_v13  ;;  %v236_v19 = vmul.f32 16.0, %v235_v11  ;;  %s1995_s24 = scalar_lea.vmem %s1758_s14, 128 }
  0x53   : > { %v2249_v2 = vsub.s32 0, %v2246_v1  ;;  %v2252_v3 = vsub.s32 1, %v2246_v1  ;;  %v2255_v4 = vadd.s32 120, %v2246_v1  ;;  %v2258_v5 = vadd.s32 112, %v2246_v1  ;;  %p1996_p13 = scmp.ne.s32.totalorder %s1758_s14, %s1995_s24  ;;  %p3514_p3 = scmp.ne.s32.totalorder %s3490_s21, 0 }
  0x54   : > { %v2261_v6 = vadd.s32 104, %v2246_v1  ;;  %v2264_v7 = vadd.s32 96, %v2246_v1  ;;  %v2267_v8 = vadd.s32 88, %v2246_v1  ;;  %v2270_v14 = vadd.s32 80, %v2246_v1  ;;  %s2067_s19 = smov [#allocation8]  }
  0x55   : > { %v2273_v17 = vadd.s32 72, %v2246_v1  ;;  %v2276_v18 = vadd.s32 64, %v2246_v1  ;;  %v240_v20 = vmul.f32 16.0, %v239_v12  ;;  %v995_v21 = vadd.f32 1.0, %v1867_v15  ;;  %p1997_p7 = pnand %p1996_p13, %p3514_p3  ;;  %s1999_s25 = sshll.u32 %s2067_s19, 4  ;;  %s2000_s25 = int_to_ptr.vmem [resolvable:$false] %s1999_s25 }
  0x56   : > { %v2279_v22 = vadd.s32 56, %v2246_v1  ;;  %v992_v23 = vmul.f32 16.0, %v991_v16  ;;  %v2282_v24 = vadd.s32 48, %v2246_v1  ;;  %v2285_v25 = vadd.s32 40, %v2246_v1  ;;  %s2001_s13 = scalar_lea.vmem %s2000_s25, 256  ;;  %p2002_p10 = scmp.lt.s32.totalorder %s1758_s14, %s2000_s25 }
  0x57   : > { %v2288_v26 = vadd.s32 32, %v2246_v1  ;;  %v1864_v27 = vadd.f32 -1.0, %v236_v19  ;;  %v1865_v28 = vadd.f32 -1.0, %v240_v20  ;;  %v996_v29 = vmul.f32 16.0, %v995_v21  ;;  %p1998_p8 = pneg %p1997_p7  ;;  %p2003_p2 = scmp.lt.s32.totalorder %s2001_s13, %s1995_s24 }
  0x58   : > { %v2291_v30 = vadd.s32 24, %v2246_v1  ;;  %v1868_v31 = vadd.f32 -1.0, %v992_v23  ;;  %v2294_v32 = vadd.s32 16, %v2246_v1  ;;  %v2297_v33 = vadd.s32 8, %v2246_v1 }
  0x59   : > { %v2300_v34 = vadd.s32 248, %v2246_v1  ;;  %v238_v35 = vmul.f32 0.5, %v1864_v27  ;;  %v242_v36 = vmul.f32 0.5, %v1865_v28  ;;  %v1869_v37 = vadd.f32 -1.0, %v996_v29  ;;  %p2004_p4 = por %p2003_p2, %p2002_p10 }
  0x5a   : > { %v2303_v38 = vadd.s32 240, %v2246_v1  ;;  %v994_v39 = vmul.f32 0.5, %v1868_v31  ;;  %v2306_v40 = vadd.s32 232, %v2246_v1  ;;  %v2309_v41 = vadd.s32 224, %v2246_v1 }
  0x5b   : > { %v2312_v42 = vadd.s32 216, %v2246_v1  ;;  %v243_v43 = vfloor.f32 %v238_v35  ;;  %v244_v44 = vfloor.f32 %v242_v36  ;;  %v998_v45 = vmul.f32 0.5, %v1869_v37  ;;  %p2005_p5 = pnand %p2004_p4, %p1998_p8 }
  0x5c   : > { %v2315_v46 = vadd.s32 208, %v2246_v1  ;;  %v999_v47 = vfloor.f32 %v994_v39  ;;  %v2318_v48 = vadd.s32 200, %v2246_v1  ;;  %v2321_v49 = vadd.s32 192, %v2246_v1 }
  0x5d   : > { %v2324_v50 = vadd.s32 184, %v2246_v1  ;;  %v245_v51 = vsub.f32 %v238_v35, %v243_v43  ;;  %v247_v52 = vsub.f32 %v242_v36, %v244_v44  ;;  %v1879_v53 = vtrunc.f32 %v243_v43 }
  0x5e   : > { %v1881_v54 = vtrunc.f32 %v244_v44  ;;  %v1000_v55 = vfloor.f32 %v998_v45  ;;  %v1001_v56 = vsub.f32 %v994_v39, %v999_v47  ;;  %v1883_v57 = vtrunc.f32 %v999_v47 }
  0x5f   : > { %v2327_v58 = vadd.s32 176, %v2246_v1  ;;  %v246_v59 = vsub.f32 1.0, %v245_v51  ;;  %v248_v60 = vsub.f32 1.0, %v247_v52  ;;  %v1880_v61 = vcvt.f32.s32 %v1879_v53 }
  0x60   : > { %v1882_v62 = vcvt.f32.s32 %v1881_v54  ;;  %v275_v63 = vmul.f32 %v247_v52, %v245_v51  ;;  %v1002_v0 = vsub.f32 1.0, %v1001_v56  ;;  %v1003_v9 = vsub.f32 %v998_v45, %v1000_v55 }
  0x61   : > { %v2329_v10 = vcvt.f32.s32 %v1883_v57  ;;  %v251_v11 = vadd.s32 1, %v1880_v61  ;;  %vm253_vm0 = vcmp.ge.s32.totalorder %v1880_v61, 0  ;;  %vm254_vm1 = vcmp.lt.s32.totalorder %v1880_v61, 16 }
  0x62   : > { %v252_v12 = vadd.s32 1, %v1882_v62  ;;  %vm2331_vm2 = vmand %vm253_vm0, %vm254_vm1  ;;  %vm259_vm3 = vcmp.ge.s32.totalorder %v1882_v62, 0  ;;  %vm260_vm4 = vcmp.lt.s32.totalorder %v1882_v62, 16  ;;  %v266_v15 = vmul.f32 %v248_v60, %v246_v59 }
  0x63   : > { %v269_v16 = vmul.f32 %v248_v60, %v245_v51  ;;  %vm256_vm5 = vcmp.ge.s32.totalorder %v251_v11, 0  ;;  %vm257_vm6 = vcmp.lt.s32.totalorder %v251_v11, 16  ;;  %vm2335_vm7 = vmand %vm259_vm3, %vm260_vm4  ;;  %v272_v21 = vmul.f32 %v247_v52, %v246_v59 }
  0x64   : > { %vm262_vm8 = vcmp.ge.s32.totalorder %v252_v12, 0  ;;  %vm263_vm9 = vcmp.lt.s32.totalorder %v252_v12, 16  ;;  %vm2339_vm10 = vmand %vm256_vm5, %vm257_vm6  ;;  %v277_v23 = vmul.u32 16, %v1882_v62  ;;  %v1004_v27 = vsub.f32 1.0, %v1003_v9 }
  0x65   : > { %v1885_v28 = vtrunc.f32 %v1000_v55  ;;  %vm2343_vm11 = vmand %vm262_vm8, %vm263_vm9  ;;  %v1007_v31 = vadd.s32 1, %v2329_v10  ;;  %vm1009_vm12 = vcmp.ge.s32.totalorder %v2329_v10, 0  ;;  %vm1010_vm13 = vcmp.lt.s32.totalorder %v2329_v10, 16 }
  0x66   : > { %v1028_v35 = vmul.f32 %v1003_v9, %v1002_v0  ;;  %vm265_vm14 = vmand %vm2331_vm2, %vm2335_vm7  ;;  %v278_v36 = vadd.s32 %v1880_v61, %v277_v23  ;;  %v1022_v39 = vmul.f32 %v1004_v27, %v1002_v0  ;;  %v1025_v43 = vmul.f32 %v1004_v27, %v1001_v56 }
  0x67   : > { %v1886_v37 = vcvt.f32.s32 %v1885_v28  ;;  %v267_v44 = vsel %vm265_vm14, %v266_v15, 0.0  ;;  %vm268_vm15 = vmand %vm2339_vm10, %vm2335_vm7  ;;  %vm1012_vm0 = vcmp.ge.s32.totalorder %v1007_v31, 0  ;;  %vm1013_vm1 = vcmp.lt.s32.totalorder %v1007_v31, 16 }
  0x68   : > { %v1031_v45 = vmul.f32 %v1003_v9, %v1001_v56  ;;  %v270_v47 = vsel %vm268_vm15, %v269_v16, 0.0  ;;  %vm271_vm3 = vmand %vm2331_vm2, %vm2343_vm11  ;;  %v2363_v51 = vrot.slane %v278_v36, %v2249_v2  ;;  %v2366_v52 = vrot.slane %v278_v36, %v2252_v3 }
  0x69   : > { %v2369_v53 = vrot.slane %v267_v44, %v2249_v2  ;;  %v273_v54 = vsel %vm271_vm3, %v272_v21, 0.0  ;;  %vm274_vm4 = vmand %vm2339_vm10, %vm2343_vm11  ;;  %v2376_v55 = vrot.slane %v270_v47, %v2249_v2  ;;  %v2379_v56 = vrot.slane %v270_v47, %v2252_v3 }
  0x6a   : > { %v2382_v57 = vrot.slane %v267_v44, %v2252_v3  ;;  %v276_v59 = vsel %vm274_vm4, %v275_v63, 0.0  ;;  %v2385_v60 = vrot.slane %v273_v54, %v2249_v2  ;;  %v2388_v61 = vrot.slane %v273_v54, %v2252_v3  ;;  %vm2394_vm2 = vmand %vm1009_vm12, %vm1010_vm13 }
  0x6b   : > { %v1008_v62 = vadd.s32 1, %v1886_v37  ;;  %v2399_v9 = vrot.slane %v276_v59, %v2249_v2  ;;  %v2402_v63 = vrot.slane %v276_v59, %v2252_v3  ;;  %vm2406_vm5 = vmand %vm1012_vm0, %vm1013_vm1  ;;  %vm1015_vm6 = vcmp.ge.s32.totalorder %v1886_v37, 0 }
  0x6c   : > { %vm1016_vm7 = vcmp.lt.s32.totalorder %v1886_v37, 16  ;;  %v1033_v13 = vmul.u32 16, %v1886_v37  ;;  %v318_v15 = vsub.s32 %v2255_v4, %v2366_v52  ;;  %v317_v19 = vsub.s32 %v2255_v4, %v2363_v51 }
  0x6d   : > { %vm2410_vm8 = vmand %vm1015_vm6, %vm1016_vm7  ;;  %vm1018_vm9 = vcmp.ge.s32.totalorder %v1008_v62, 0  ;;  %vm1019_vm10 = vcmp.lt.s32.totalorder %v1008_v62, 16  ;;  %v316_v20 = vsub.s32 %v2258_v5, %v2366_v52  ;;  %v2426_v21 = vsub.s32 %v2258_v5, %v2363_v51 }
  0x6e   : > { %vm2416_vm11 = vmand %vm1018_vm9, %vm1019_vm10  ;;  %v2430_v23 = vsub.s32 %v2261_v6, %v2366_v52  ;;  %v1034_v27 = vadd.s32 %v2329_v10, %v1033_v13  ;;  %vm382_vm13 = vcmp.eq.s32.totalorder %v318_v15, 0  ;;  %vm446_vm14 = vcmp.eq.s32.totalorder %v318_v15, 1 }
  0x6f   : > { %vm1021_vm12 = vmand %vm2394_vm2, %vm2410_vm8  ;;  %vm510_vm15 = vcmp.eq.s32.totalorder %v318_v15, 16  ;;  %vm574_vm1 = vcmp.eq.s32.totalorder %v318_v15, 17  ;;  %vm381_vm3 = vcmp.eq.s32.totalorder %v317_v19, 0  ;;  %vm445_vm4 = vcmp.eq.s32.totalorder %v317_v19, 1 }
  0x70   : > { %v1023_v28 = vsel %vm1021_vm12, %v1022_v39, 0.0  ;;  %vm1024_vm0 = vmand %vm2406_vm5, %vm2410_vm8  ;;  %v2446_v10 = vrot.slane %v1034_v27, %v2249_v2  ;;  %v2449_v31 = vrot.slane %v1034_v27, %v2252_v3  ;;  %v649_v59 = vsel %vm574_vm1, %v2402_v63, 0.0 }
  0x71   : > { %v1026_v29 = vsel %vm1024_vm0, %v1025_v43, 0.0  ;;  %vm1027_vm6 = vmand %vm2394_vm2, %vm2416_vm11  ;;  %v2452_v36 = vrot.slane %v1023_v28, %v2249_v2  ;;  %v2465_v44 = vrot.slane %v1023_v28, %v2252_v3  ;;  %v724_v11 = vsel %vm510_vm15, %v2388_v61, %v649_v59 }
  0x72   : > { %v1029_v37 = vsel %vm1027_vm6, %v1028_v35, 0.0  ;;  %vm1030_vm7 = vmand %vm2406_vm5, %vm2416_vm11  ;;  %v2459_v39 = vrot.slane %v1026_v29, %v2249_v2  ;;  %v2462_v43 = vrot.slane %v1026_v29, %v2252_v3  ;;  %vm509_vm2 = vcmp.eq.s32.totalorder %v317_v19, 16 }
  0x73   : > { %v1032_v47 = vsel %vm1030_vm7, %v1031_v45, 0.0  ;;  %v2468_v54 = vrot.slane %v1029_v37, %v2249_v2  ;;  %v2471_v35 = vrot.slane %v1029_v37, %v2252_v3  ;;  %v799_v45 = vsel %vm446_vm14, %v2379_v56, %v724_v11 }
  0x74   : > { %v2476_v62 = vrot.slane %v1032_v47, %v2249_v2  ;;  %v2479_v0 = vrot.slane %v1032_v47, %v2252_v3  ;;  %vm573_vm5 = vcmp.eq.s32.totalorder %v317_v19, 17  ;;  %vm380_vm8 = vcmp.eq.s32.totalorder %v316_v20, 0 }
  0x75   : > { %vm444_vm9 = vcmp.eq.s32.totalorder %v316_v20, 1  ;;  %v874_v12 = vsel %vm382_vm13, %v2382_v57, %v799_v45  ;;  %v648_v13 = vsel %vm573_vm5, %v2399_v9, 0.0  ;;  %vm508_vm10 = vcmp.eq.s32.totalorder %v316_v20, 16 }
  0x76   : > { %vm572_vm11 = vcmp.eq.s32.totalorder %v316_v20, 17  ;;  %910 = vmatprep.subr.mxu0 %v874_v12  ;;  %v723_v2 = vsel %vm509_vm2, %v2385_v60, %v648_v13  ;;  %vm379_vm12 = vcmp.eq.s32.totalorder %v2426_v21, 0  ;;  %vm443_vm15 = vcmp.eq.s32.totalorder %v2426_v21, 1 }
  0x77   : > { %v647_v3 = vsel %vm572_vm11, %v2402_v63, 0.0  ;;  %v798_v16 = vsel %vm445_vm4, %v2376_v55, %v723_v2  ;;  %vm507_vm13 = vcmp.eq.s32.totalorder %v2426_v21, 16  ;;  %vm571_vm14 = vcmp.eq.s32.totalorder %v2426_v21, 17 }
  0x78   : > { %v722_v27 = vsel %vm508_vm10, %v2388_v61, %v647_v3  ;;  %v873_v15 = vsel %vm381_vm3, %v2369_v53, %v798_v16  ;;  %v646_v29 = vsel %vm571_vm14, %v2399_v9, 0.0  ;;  %vm378_vm0 = vcmp.eq.s32.totalorder %v2430_v23, 0 }
  0x79   : > { %v797_v28 = vsel %vm444_vm9, %v2379_v56, %v722_v27  ;;  %911 = vmatpush1.msra.mxu0 %v873_v15  ;;  %v721_v47 = vsel %vm507_vm13, %v2385_v60, %v646_v29  ;;  %vm442_vm1 = vcmp.eq.s32.totalorder %v2430_v23, 1  ;;  %vm506_vm4 = vcmp.eq.s32.totalorder %v2430_v23, 16 }
  0x7a   : > { %v872_v37 = vsel %vm380_vm8, %v2382_v57, %v797_v28  ;;  %v796_v19 = vsel %vm443_vm15, %v2376_v55, %v721_v47  ;;  %vm570_vm3 = vcmp.eq.s32.totalorder %v2430_v23, 17  ;;  %v313_v59 = vsub.s32 %v2261_v6, %v2363_v51 }
  0x7b   : > { %912 = vmatprep.subr.mxu0 %v872_v37  ;;  %v312_v11 = vsub.s32 %v2264_v7, %v2366_v52  ;;  %v871_v20 = vsel %vm379_vm12, %v2369_v53, %v796_v19  ;;  %v645_v45 = vsel %vm570_vm3, %v2402_v63, 0.0  ;;  %v311_v12 = vsub.s32 %v2264_v7, %v2363_v51 }
  0x7c   : > { %v310_v13 = vsub.s32 %v2267_v8, %v2366_v52  ;;  %913 = vmatpush1.msra.mxu0 %v871_v20  ;;  %v720_v2 = vsel %vm506_vm4, %v2388_v61, %v645_v45  ;;  %vm377_vm6 = vcmp.eq.s32.totalorder %v313_v59, 0  ;;  %vm441_vm7 = vcmp.eq.s32.totalorder %v313_v59, 1 }
  0x7d   : > { %vm505_vm2 = vcmp.eq.s32.totalorder %v313_v59, 16  ;;  %v795_v3 = vsel %vm442_vm1, %v2379_v56, %v720_v2  ;;  %vm569_vm5 = vcmp.eq.s32.totalorder %v313_v59, 17  ;;  %vm376_vm8 = vcmp.eq.s32.totalorder %v312_v11, 0 }
  0x7e   : > { %vm440_vm9 = vcmp.eq.s32.totalorder %v312_v11, 1  ;;  %v870_v21 = vsel %vm378_vm0, %v2382_v57, %v795_v3  ;;  %v644_v16 = vsel %vm569_vm5, %v2399_v9, 0.0  ;;  %vm504_vm10 = vcmp.eq.s32.totalorder %v312_v11, 16 }
  0x7f   : > { %vm568_vm11 = vcmp.eq.s32.totalorder %v312_v11, 17  ;;  %914 = vmatprep.subr.mxu0 %v870_v21  ;;  %v719_v27 = vsel %vm505_vm2, %v2385_v60, %v644_v16  ;;  %vm375_vm12 = vcmp.eq.s32.totalorder %v311_v12, 0  ;;  %vm439_vm15 = vcmp.eq.s32.totalorder %v311_v12, 1 }
  0x80   : > { %v643_v15 = vsel %vm568_vm11, %v2402_v63, 0.0  ;;  %v794_v28 = vsel %vm441_vm7, %v2376_v55, %v719_v27  ;;  %vm503_vm13 = vcmp.eq.s32.totalorder %v311_v12, 16  ;;  %vm567_vm14 = vcmp.eq.s32.totalorder %v311_v12, 17 }
  0x81   : > { %v718_v29 = vsel %vm504_vm10, %v2388_v61, %v643_v15  ;;  %v869_v23 = vsel %vm377_vm6, %v2369_v53, %v794_v28  ;;  %v642_v47 = vsel %vm567_vm14, %v2399_v9, 0.0  ;;  %vm374_vm0 = vcmp.eq.s32.totalorder %v310_v13, 0 }
  0x82   : > { %v793_v37 = vsel %vm440_vm9, %v2379_v56, %v718_v29  ;;  %915 = vmatpush1.msra.mxu0 %v869_v23  ;;  %v717_v20 = vsel %vm503_vm13, %v2385_v60, %v642_v47  ;;  %vm438_vm1 = vcmp.eq.s32.totalorder %v310_v13, 1  ;;  %vm502_vm4 = vcmp.eq.s32.totalorder %v310_v13, 16 }
  0x83   : > { %v868_v19 = vsel %vm376_vm8, %v2382_v57, %v793_v37  ;;  %v792_v45 = vsel %vm439_vm15, %v2376_v55, %v717_v20  ;;  %vm566_vm3 = vcmp.eq.s32.totalorder %v310_v13, 17  ;;  %v309_v59 = vsub.s32 %v2267_v8, %v2363_v51 }
  0x84   : > { %916 = vmatprep.subr.mxu0 %v868_v19  ;;  %v308_v2 = vsub.s32 %v2270_v14, %v2366_v52  ;;  %v867_v3 = vsel %vm375_vm12, %v2369_v53, %v792_v45  ;;  %v641_v11 = vsel %vm566_vm3, %v2402_v63, 0.0  ;;  %v307_v21 = vsub.s32 %v2270_v14, %v2363_v51 }
  0x85   : > { %v306_v16 = vsub.s32 %v2273_v17, %v2366_v52  ;;  %917 = vmatpush1.msra.mxu0 %v867_v3  ;;  %v716_v27 = vsel %vm502_vm4, %v2388_v61, %v641_v11  ;;  %vm373_vm6 = vcmp.eq.s32.totalorder %v309_v59, 0  ;;  %vm437_vm7 = vcmp.eq.s32.totalorder %v309_v59, 1 }
  0x86   : > { %vm501_vm2 = vcmp.eq.s32.totalorder %v309_v59, 16  ;;  %v791_v15 = vsel %vm438_vm1, %v2379_v56, %v716_v27  ;;  %vm565_vm5 = vcmp.eq.s32.totalorder %v309_v59, 17  ;;  %vm372_vm8 = vcmp.eq.s32.totalorder %v308_v2, 0 }
  0x87   : > { %vm436_vm9 = vcmp.eq.s32.totalorder %v308_v2, 1  ;;  %v866_v12 = vsel %vm374_vm0, %v2382_v57, %v791_v15  ;;  %v640_v28 = vsel %vm565_vm5, %v2399_v9, 0.0  ;;  %vm500_vm10 = vcmp.eq.s32.totalorder %v308_v2, 16 }
  0x88   : > { %vm564_vm11 = vcmp.eq.s32.totalorder %v308_v2, 17  ;;  %918 = vmatprep.subr.mxu0 %v866_v12  ;;  %v715_v29 = vsel %vm501_vm2, %v2385_v60, %v640_v28  ;;  %vm371_vm12 = vcmp.eq.s32.totalorder %v307_v21, 0  ;;  %vm435_vm15 = vcmp.eq.s32.totalorder %v307_v21, 1 }
  0x89   : > { %v639_v23 = vsel %vm564_vm11, %v2402_v63, 0.0  ;;  %v790_v37 = vsel %vm437_vm7, %v2376_v55, %v715_v29  ;;  %vm499_vm13 = vcmp.eq.s32.totalorder %v307_v21, 16  ;;  %vm563_vm14 = vcmp.eq.s32.totalorder %v307_v21, 17 }
  0x8a   : > { %v714_v47 = vsel %vm500_vm10, %v2388_v61, %v639_v23  ;;  %v865_v13 = vsel %vm373_vm6, %v2369_v53, %v790_v37  ;;  %v638_v20 = vsel %vm563_vm14, %v2399_v9, 0.0  ;;  %vm370_vm0 = vcmp.eq.s32.totalorder %v306_v16, 0 }
  0x8b   : > { %v789_v19 = vsel %vm436_vm9, %v2379_v56, %v714_v47  ;;  %919 = vmatpush1.msra.mxu0 %v865_v13  ;;  %v713_v3 = vsel %vm499_vm13, %v2385_v60, %v638_v20  ;;  %vm434_vm1 = vcmp.eq.s32.totalorder %v306_v16, 1  ;;  %vm498_vm4 = vcmp.eq.s32.totalorder %v306_v16, 16 }
  0x8c   : > { %v864_v45 = vsel %vm372_vm8, %v2382_v57, %v789_v19  ;;  %v788_v11 = vsel %vm435_vm15, %v2376_v55, %v713_v3  ;;  %vm562_vm3 = vcmp.eq.s32.totalorder %v306_v16, 17  ;;  %v305_v59 = vsub.s32 %v2273_v17, %v2363_v51 }
  0x8d   : > { %920 = vmatprep.subr.mxu0 %v864_v45  ;;  %v304_v27 = vsub.s32 %v2276_v18, %v2366_v52  ;;  %v863_v15 = vsel %vm371_vm12, %v2369_v53, %v788_v11  ;;  %v637_v2 = vsel %vm562_vm3, %v2402_v63, 0.0  ;;  %v303_v12 = vsub.s32 %v2276_v18, %v2363_v51 }
  0x8e   : > { %v302_v28 = vsub.s32 %v2279_v22, %v2366_v52  ;;  %921 = vmatpush1.msra.mxu0 %v863_v15  ;;  %v712_v29 = vsel %vm498_vm4, %v2388_v61, %v637_v2  ;;  %vm369_vm6 = vcmp.eq.s32.totalorder %v305_v59, 0  ;;  %vm433_vm7 = vcmp.eq.s32.totalorder %v305_v59, 1 }
  0x8f   : > { %vm497_vm2 = vcmp.eq.s32.totalorder %v305_v59, 16  ;;  %v787_v23 = vsel %vm434_vm1, %v2379_v56, %v712_v29  ;;  %vm561_vm5 = vcmp.eq.s32.totalorder %v305_v59, 17  ;;  %vm368_vm8 = vcmp.eq.s32.totalorder %v304_v27, 0 }
  0x90   : > { %vm432_vm9 = vcmp.eq.s32.totalorder %v304_v27, 1  ;;  %v862_v21 = vsel %vm370_vm0, %v2382_v57, %v787_v23  ;;  %v636_v37 = vsel %vm561_vm5, %v2399_v9, 0.0  ;;  %vm496_vm10 = vcmp.eq.s32.totalorder %v304_v27, 16 }
  0x91   : > { %vm560_vm11 = vcmp.eq.s32.totalorder %v304_v27, 17  ;;  %922 = vmatprep.subr.mxu0 %v862_v21  ;;  %v711_v47 = vsel %vm497_vm2, %v2385_v60, %v636_v37  ;;  %vm367_vm12 = vcmp.eq.s32.totalorder %v303_v12, 0  ;;  %vm431_vm15 = vcmp.eq.s32.totalorder %v303_v12, 1 }
  0x92   : > { %v635_v13 = vsel %vm560_vm11, %v2402_v63, 0.0  ;;  %v786_v19 = vsel %vm433_vm7, %v2376_v55, %v711_v47  ;;  %vm495_vm13 = vcmp.eq.s32.totalorder %v303_v12, 16  ;;  %vm559_vm14 = vcmp.eq.s32.totalorder %v303_v12, 17 }
  0x93   : > { %v710_v20 = vsel %vm496_vm10, %v2388_v61, %v635_v13  ;;  %v861_v16 = vsel %vm369_vm6, %v2369_v53, %v786_v19  ;;  %v634_v3 = vsel %vm559_vm14, %v2399_v9, 0.0  ;;  %vm366_vm0 = vcmp.eq.s32.totalorder %v302_v28, 0 }
  0x94   : > { %v785_v45 = vsel %vm432_vm9, %v2379_v56, %v710_v20  ;;  %923 = vmatpush1.msra.mxu0 %v861_v16  ;;  %v709_v15 = vsel %vm495_vm13, %v2385_v60, %v634_v3  ;;  %vm430_vm1 = vcmp.eq.s32.totalorder %v302_v28, 1  ;;  %vm494_vm4 = vcmp.eq.s32.totalorder %v302_v28, 16 }
  0x95   : > { %v860_v11 = vsel %vm368_vm8, %v2382_v57, %v785_v45  ;;  %v784_v2 = vsel %vm431_vm15, %v2376_v55, %v709_v15  ;;  %vm558_vm3 = vcmp.eq.s32.totalorder %v302_v28, 17  ;;  %v301_v59 = vsub.s32 %v2279_v22, %v2363_v51 }
  0x96   : > { %924 = vmatprep.subr.mxu0 %v860_v11  ;;  %v300_v29 = vsub.s32 %v2282_v24, %v2366_v52  ;;  %v859_v23 = vsel %vm367_vm12, %v2369_v53, %v784_v2  ;;  %v633_v27 = vsel %vm558_vm3, %v2402_v63, 0.0  ;;  %v299_v21 = vsub.s32 %v2282_v24, %v2363_v51 }
  0x97   : > { %v298_v37 = vsub.s32 %v2285_v25, %v2366_v52  ;;  %925 = vmatpush1.msra.mxu0 %v859_v23  ;;  %v708_v47 = vsel %vm494_vm4, %v2388_v61, %v633_v27  ;;  %vm365_vm6 = vcmp.eq.s32.totalorder %v301_v59, 0  ;;  %vm429_vm7 = vcmp.eq.s32.totalorder %v301_v59, 1 }
  0x98   : > { %vm493_vm2 = vcmp.eq.s32.totalorder %v301_v59, 16  ;;  %v783_v13 = vsel %vm430_vm1, %v2379_v56, %v708_v47  ;;  %vm557_vm5 = vcmp.eq.s32.totalorder %v301_v59, 17  ;;  %vm364_vm8 = vcmp.eq.s32.totalorder %v300_v29, 0 }
  0x99   : > { %vm428_vm9 = vcmp.eq.s32.totalorder %v300_v29, 1  ;;  %v858_v12 = vsel %vm366_vm0, %v2382_v57, %v783_v13  ;;  %v632_v19 = vsel %vm557_vm5, %v2399_v9, 0.0  ;;  %vm492_vm10 = vcmp.eq.s32.totalorder %v300_v29, 16 }
  0x9a   : > { %vm556_vm11 = vcmp.eq.s32.totalorder %v300_v29, 17  ;;  %926 = vmatprep.subr.mxu0 %v858_v12  ;;  %v707_v20 = vsel %vm493_vm2, %v2385_v60, %v632_v19  ;;  %vm363_vm12 = vcmp.eq.s32.totalorder %v299_v21, 0  ;;  %vm427_vm15 = vcmp.eq.s32.totalorder %v299_v21, 1 }
  0x9b   : > { %v631_v16 = vsel %vm556_vm11, %v2402_v63, 0.0  ;;  %v782_v45 = vsel %vm429_vm7, %v2376_v55, %v707_v20  ;;  %vm491_vm13 = vcmp.eq.s32.totalorder %v299_v21, 16  ;;  %vm555_vm14 = vcmp.eq.s32.totalorder %v299_v21, 17 }
  0x9c   : > { %v706_v3 = vsel %vm492_vm10, %v2388_v61, %v631_v16  ;;  %v857_v28 = vsel %vm365_vm6, %v2369_v53, %v782_v45  ;;  %v630_v15 = vsel %vm555_vm14, %v2399_v9, 0.0  ;;  %vm362_vm0 = vcmp.eq.s32.totalorder %v298_v37, 0 }
  0x9d   : > { %v781_v11 = vsel %vm428_vm9, %v2379_v56, %v706_v3  ;;  %927 = vmatpush1.msra.mxu0 %v857_v28  ;;  %v705_v23 = vsel %vm491_vm13, %v2385_v60, %v630_v15  ;;  %vm426_vm1 = vcmp.eq.s32.totalorder %v298_v37, 1  ;;  %vm490_vm4 = vcmp.eq.s32.totalorder %v298_v37, 16 }
  0x9e   : > { %v856_v2 = vsel %vm364_vm8, %v2382_v57, %v781_v11  ;;  %v780_v27 = vsel %vm427_vm15, %v2376_v55, %v705_v23  ;;  %vm554_vm3 = vcmp.eq.s32.totalorder %v298_v37, 17  ;;  %v297_v59 = vsub.s32 %v2285_v25, %v2363_v51 }
  0x9f   : > { %928 = vmatprep.subr.mxu0 %v856_v2  ;;  %v296_v47 = vsub.s32 %v2288_v26, %v2366_v52  ;;  %v855_v13 = vsel %vm363_vm12, %v2369_v53, %v780_v27  ;;  %v629_v29 = vsel %vm554_vm3, %v2402_v63, 0.0  ;;  %v295_v12 = vsub.s32 %v2288_v26, %v2363_v51 }
  0xa0   : > { %v294_v19 = vsub.s32 %v2291_v30, %v2366_v52  ;;  %929 = vmatpush1.msra.mxu0 %v855_v13  ;;  %v704_v20 = vsel %vm490_vm4, %v2388_v61, %v629_v29  ;;  %vm361_vm6 = vcmp.eq.s32.totalorder %v297_v59, 0  ;;  %vm425_vm7 = vcmp.eq.s32.totalorder %v297_v59, 1 }
  0xa1   : > { %vm489_vm2 = vcmp.eq.s32.totalorder %v297_v59, 16  ;;  %v779_v16 = vsel %vm426_vm1, %v2379_v56, %v704_v20  ;;  %vm553_vm5 = vcmp.eq.s32.totalorder %v297_v59, 17  ;;  %vm360_vm8 = vcmp.eq.s32.totalorder %v296_v47, 0 }
  0xa2   : > { %vm424_vm9 = vcmp.eq.s32.totalorder %v296_v47, 1  ;;  %v854_v21 = vsel %vm362_vm0, %v2382_v57, %v779_v16  ;;  %v628_v45 = vsel %vm553_vm5, %v2399_v9, 0.0  ;;  %vm488_vm10 = vcmp.eq.s32.totalorder %v296_v47, 16 }
  0xa3   : > { %vm552_vm11 = vcmp.eq.s32.totalorder %v296_v47, 17  ;;  %930 = vmatprep.subr.mxu0 %v854_v21  ;;  %v703_v3 = vsel %vm489_vm2, %v2385_v60, %v628_v45  ;;  %vm359_vm12 = vcmp.eq.s32.totalorder %v295_v12, 0  ;;  %vm423_vm15 = vcmp.eq.s32.totalorder %v295_v12, 1 }
  0xa4   : > { %v627_v28 = vsel %vm552_vm11, %v2402_v63, 0.0  ;;  %v778_v11 = vsel %vm425_vm7, %v2376_v55, %v703_v3  ;;  %vm487_vm13 = vcmp.eq.s32.totalorder %v295_v12, 16  ;;  %vm551_vm14 = vcmp.eq.s32.totalorder %v295_v12, 17 }
  0xa5   : > { %v702_v15 = vsel %vm488_vm10, %v2388_v61, %v627_v28  ;;  %v853_v37 = vsel %vm361_vm6, %v2369_v53, %v778_v11  ;;  %v626_v23 = vsel %vm551_vm14, %v2399_v9, 0.0  ;;  %vm358_vm0 = vcmp.eq.s32.totalorder %v294_v19, 0 }
  0xa6   : > { %v777_v2 = vsel %vm424_vm9, %v2379_v56, %v702_v15  ;;  %931 = vmatpush1.msra.mxu0 %v853_v37  ;;  %v701_v13 = vsel %vm487_vm13, %v2385_v60, %v626_v23  ;;  %vm422_vm1 = vcmp.eq.s32.totalorder %v294_v19, 1  ;;  %vm486_vm4 = vcmp.eq.s32.totalorder %v294_v19, 16 }
  0xa7   : > { %v852_v27 = vsel %vm360_vm8, %v2382_v57, %v777_v2  ;;  %v776_v29 = vsel %vm423_vm15, %v2376_v55, %v701_v13  ;;  %vm550_vm3 = vcmp.eq.s32.totalorder %v294_v19, 17  ;;  %v293_v59 = vsub.s32 %v2291_v30, %v2363_v51 }
  0xa8   : > { %932 = vmatprep.subr.mxu0 %v852_v27  ;;  %v292_v20 = vsub.s32 %v2294_v32, %v2366_v52  ;;  %v851_v16 = vsel %vm359_vm12, %v2369_v53, %v776_v29  ;;  %v625_v47 = vsel %vm550_vm3, %v2402_v63, 0.0  ;;  %v291_v21 = vsub.s32 %v2294_v32, %v2363_v51 }
  0xa9   : > { %v290_v45 = vsub.s32 %v2297_v33, %v2366_v52  ;;  %933 = vmatpush1.msra.mxu0 %v851_v16  ;;  %v700_v3 = vsel %vm486_vm4, %v2388_v61, %v625_v47  ;;  %vm357_vm6 = vcmp.eq.s32.totalorder %v293_v59, 0  ;;  %vm421_vm7 = vcmp.eq.s32.totalorder %v293_v59, 1 }
  0xaa   : > { %vm485_vm2 = vcmp.eq.s32.totalorder %v293_v59, 16  ;;  %v775_v28 = vsel %vm422_vm1, %v2379_v56, %v700_v3  ;;  %vm549_vm5 = vcmp.eq.s32.totalorder %v293_v59, 17  ;;  %vm356_vm8 = vcmp.eq.s32.totalorder %v292_v20, 0 }
  0xab   : > { %vm420_vm9 = vcmp.eq.s32.totalorder %v292_v20, 1  ;;  %v850_v12 = vsel %vm358_vm0, %v2382_v57, %v775_v28  ;;  %v624_v11 = vsel %vm549_vm5, %v2399_v9, 0.0  ;;  %vm484_vm10 = vcmp.eq.s32.totalorder %v292_v20, 16 }
  0xac   : > { %vm548_vm11 = vcmp.eq.s32.totalorder %v292_v20, 17  ;;  %934 = vmatprep.subr.mxu0 %v850_v12  ;;  %v699_v15 = vsel %vm485_vm2, %v2385_v60, %v624_v11  ;;  %vm355_vm12 = vcmp.eq.s32.totalorder %v291_v21, 0  ;;  %vm419_vm15 = vcmp.eq.s32.totalorder %v291_v21, 1 }
  0xad   : > { %v623_v37 = vsel %vm548_vm11, %v2402_v63, 0.0  ;;  %v774_v2 = vsel %vm421_vm7, %v2376_v55, %v699_v15  ;;  %vm483_vm13 = vcmp.eq.s32.totalorder %v291_v21, 16  ;;  %vm547_vm14 = vcmp.eq.s32.totalorder %v291_v21, 17 }
  0xae   : > { %v698_v23 = vsel %vm484_vm10, %v2388_v61, %v623_v37  ;;  %v849_v19 = vsel %vm357_vm6, %v2369_v53, %v774_v2  ;;  %v622_v13 = vsel %vm547_vm14, %v2399_v9, 0.0  ;;  %vm354_vm0 = vcmp.eq.s32.totalorder %v290_v45, 0 }
  0xaf   : > { %v773_v27 = vsel %vm420_vm9, %v2379_v56, %v698_v23  ;;  %935 = vmatpush1.msra.mxu0 %v849_v19  ;;  %v697_v16 = vsel %vm483_vm13, %v2385_v60, %v622_v13  ;;  %vm418_vm1 = vcmp.eq.s32.totalorder %v290_v45, 1  ;;  %vm482_vm4 = vcmp.eq.s32.totalorder %v290_v45, 16 }
  0xb0   : > { %v848_v29 = vsel %vm356_vm8, %v2382_v57, %v773_v27  ;;  %v772_v47 = vsel %vm419_vm15, %v2376_v55, %v697_v16  ;;  %vm546_vm3 = vcmp.eq.s32.totalorder %v290_v45, 17  ;;  %v289_v59 = vsub.s32 %v2297_v33, %v2363_v51 }
  0xb1   : > { %936 = vmatprep.subr.mxu0 %v848_v29  ;;  %v288_v3 = vsub.s32 %v2246_v1, %v2366_v52  ;;  %v847_v28 = vsel %vm355_vm12, %v2369_v53, %v772_v47  ;;  %v621_v20 = vsel %vm546_vm3, %v2402_v63, 0.0  ;;  %v287_v12 = vsub.s32 %v2246_v1, %v2363_v51 }
  0xb2   : > { %v350_v11 = vsub.s32 %v2300_v34, %v2366_v52  ;;  %937 = vmatpush1.msra.mxu0 %v847_v28  ;;  %v696_v15 = vsel %vm482_vm4, %v2388_v61, %v621_v20  ;;  %vm353_vm6 = vcmp.eq.s32.totalorder %v289_v59, 0  ;;  %vm417_vm7 = vcmp.eq.s32.totalorder %v289_v59, 1 }
  0xb3   : > { %vm481_vm2 = vcmp.eq.s32.totalorder %v289_v59, 16  ;;  %v771_v37 = vsel %vm418_vm1, %v2379_v56, %v696_v15  ;;  %vm545_vm5 = vcmp.eq.s32.totalorder %v289_v59, 17  ;;  %vm352_vm8 = vcmp.eq.s32.totalorder %v288_v3, 0 }
  0xb4   : > { %vm416_vm9 = vcmp.eq.s32.totalorder %v288_v3, 1  ;;  %v846_v21 = vsel %vm354_vm0, %v2382_v57, %v771_v37  ;;  %v620_v2 = vsel %vm545_vm5, %v2399_v9, 0.0  ;;  %vm480_vm10 = vcmp.eq.s32.totalorder %v288_v3, 16 }
  0xb5   : > { %vm544_vm11 = vcmp.eq.s32.totalorder %v288_v3, 17  ;;  %938 = vmatprep.subr.mxu0 %v846_v21  ;;  %v695_v23 = vsel %vm481_vm2, %v2385_v60, %v620_v2  ;;  %vm351_vm12 = vcmp.eq.s32.totalorder %v287_v12, 0  ;;  %vm415_vm15 = vcmp.eq.s32.totalorder %v287_v12, 1 }
  0xb6   : > { %v619_v19 = vsel %vm544_vm11, %v2402_v63, 0.0  ;;  %v770_v27 = vsel %vm417_vm7, %v2376_v55, %v695_v23  ;;  %vm479_vm13 = vcmp.eq.s32.totalorder %v287_v12, 16  ;;  %vm543_vm14 = vcmp.eq.s32.totalorder %v287_v12, 17 }
  0xb7   : > { %v694_v13 = vsel %vm480_vm10, %v2388_v61, %v619_v19  ;;  %v845_v45 = vsel %vm353_vm6, %v2369_v53, %v770_v27  ;;  %v618_v16 = vsel %vm543_vm14, %v2399_v9, 0.0  ;;  %vm414_vm0 = vcmp.eq.s32.totalorder %v350_v11, 0 }
  0xb8   : > { %v769_v29 = vsel %vm416_vm9, %v2379_v56, %v694_v13  ;;  %939 = vmatpush1.msra.mxu0 %v845_v45  ;;  %v693_v28 = vsel %vm479_vm13, %v2385_v60, %v618_v16  ;;  %vm478_vm1 = vcmp.eq.s32.totalorder %v350_v11, 1  ;;  %vm542_vm4 = vcmp.eq.s32.totalorder %v350_v11, 16 }
  0xb9   : > { %v844_v47 = vsel %vm352_vm8, %v2382_v57, %v769_v29  ;;  %v768_v20 = vsel %vm415_vm15, %v2376_v55, %v693_v28  ;;  %vm606_vm3 = vcmp.eq.s32.totalorder %v350_v11, 17  ;;  %v349_v59 = vsub.s32 %v2300_v34, %v2363_v51 }
  0xba   : > { %940 = vmatprep.subr.mxu0 %v844_v47  ;;  %v348_v15 = vsub.s32 %v2303_v38, %v2366_v52  ;;  %v843_v37 = vsel %vm351_vm12, %v2369_v53, %v768_v20  ;;  %v681_v3 = vsel %vm606_vm3, %v2402_v63, 0.0  ;;  %v347_v21 = vsub.s32 %v2303_v38, %v2363_v51 }
  0xbb   : > { %v346_v2 = vsub.s32 %v2306_v40, %v2366_v52  ;;  %941 = vmatpush1.msra.mxu0 %v843_v37  ;;  %v756_v23 = vsel %vm542_vm4, %v2388_v61, %v681_v3  ;;  %vm413_vm6 = vcmp.eq.s32.totalorder %v349_v59, 0  ;;  %vm477_vm7 = vcmp.eq.s32.totalorder %v349_v59, 1 }
  0xbc   : > { %vm541_vm2 = vcmp.eq.s32.totalorder %v349_v59, 16  ;;  %v831_v19 = vsel %vm478_vm1, %v2379_v56, %v756_v23  ;;  %vm605_vm5 = vcmp.eq.s32.totalorder %v349_v59, 17  ;;  %vm412_vm8 = vcmp.eq.s32.totalorder %v348_v15, 0 }
  0xbd   : > { %vm476_vm9 = vcmp.eq.s32.totalorder %v348_v15, 1  ;;  %v906_v12 = vsel %vm414_vm0, %v2382_v57, %v831_v19  ;;  %v680_v27 = vsel %vm605_vm5, %v2399_v9, 0.0  ;;  %vm540_vm10 = vcmp.eq.s32.totalorder %v348_v15, 16 }
  0xbe   : > { %vm604_vm11 = vcmp.eq.s32.totalorder %v348_v15, 17  ;;  %942 = vmatprep.subr.mxu0 %v906_v12  ;;  %v755_v13 = vsel %vm541_vm2, %v2385_v60, %v680_v27  ;;  %vm411_vm12 = vcmp.eq.s32.totalorder %v347_v21, 0  ;;  %vm475_vm15 = vcmp.eq.s32.totalorder %v347_v21, 1 }
  0xbf   : > { %v679_v45 = vsel %vm604_vm11, %v2402_v63, 0.0  ;;  %v830_v29 = vsel %vm477_vm7, %v2376_v55, %v755_v13  ;;  %vm539_vm13 = vcmp.eq.s32.totalorder %v347_v21, 16  ;;  %vm603_vm14 = vcmp.eq.s32.totalorder %v347_v21, 17 }
  0xc0   : > { %v754_v16 = vsel %vm540_vm10, %v2388_v61, %v679_v45  ;;  %v905_v11 = vsel %vm413_vm6, %v2369_v53, %v830_v29  ;;  %v678_v28 = vsel %vm603_vm14, %v2399_v9, 0.0  ;;  %vm410_vm0 = vcmp.eq.s32.totalorder %v346_v2, 0 }
  0xc1   : > { %v829_v47 = vsel %vm476_vm9, %v2379_v56, %v754_v16  ;;  %943 = vmatpush2.msra.mxu0 %v905_v11  ;;  %v753_v37 = vsel %vm539_vm13, %v2385_v60, %v678_v28  ;;  %vm474_vm1 = vcmp.eq.s32.totalorder %v346_v2, 1  ;;  %vm538_vm4 = vcmp.eq.s32.totalorder %v346_v2, 16 }
  0xc2   : > { %v904_v20 = vsel %vm412_vm8, %v2382_v57, %v829_v47  ;;  %v828_v3 = vsel %vm475_vm15, %v2376_v55, %v753_v37  ;;  %vm602_vm3 = vcmp.eq.s32.totalorder %v346_v2, 17  ;;  %v345_v59 = vsub.s32 %v2306_v40, %v2363_v51 }
  0xc3   : > { %944 = vmatprep.subr.mxu0 %v904_v20  ;;  %v344_v23 = vsub.s32 %v2309_v41, %v2366_v52  ;;  %v903_v19 = vsel %vm411_vm12, %v2369_v53, %v828_v3  ;;  %v677_v15 = vsel %vm602_vm3, %v2402_v63, 0.0  ;;  %v343_v12 = vsub.s32 %v2309_v41, %v2363_v51 }
  0xc4   : > { %v342_v27 = vsub.s32 %v2312_v42, %v2366_v52  ;;  %945 = vmatpush2.msra.mxu0 %v903_v19  ;;  %v752_v13 = vsel %vm538_vm4, %v2388_v61, %v677_v15  ;;  %vm409_vm6 = vcmp.eq.s32.totalorder %v345_v59, 0  ;;  %vm473_vm7 = vcmp.eq.s32.totalorder %v345_v59, 1 }
  0xc5   : > { %vm537_vm2 = vcmp.eq.s32.totalorder %v345_v59, 16  ;;  %v827_v45 = vsel %vm474_vm1, %v2379_v56, %v752_v13  ;;  %vm601_vm5 = vcmp.eq.s32.totalorder %v345_v59, 17  ;;  %vm408_vm8 = vcmp.eq.s32.totalorder %v344_v23, 0 }
  0xc6   : > { %vm472_vm9 = vcmp.eq.s32.totalorder %v344_v23, 1  ;;  %v902_v21 = vsel %vm410_vm0, %v2382_v57, %v827_v45  ;;  %v676_v29 = vsel %vm601_vm5, %v2399_v9, 0.0  ;;  %vm536_vm10 = vcmp.eq.s32.totalorder %v344_v23, 16 }
  0xc7   : > { %vm600_vm11 = vcmp.eq.s32.totalorder %v344_v23, 17  ;;  %946 = vmatprep.subr.mxu0 %v902_v21  ;;  %v751_v16 = vsel %vm537_vm2, %v2385_v60, %v676_v29  ;;  %vm407_vm12 = vcmp.eq.s32.totalorder %v343_v12, 0  ;;  %vm471_vm15 = vcmp.eq.s32.totalorder %v343_v12, 1 }
  0xc8   : > { %v675_v11 = vsel %vm600_vm11, %v2402_v63, 0.0  ;;  %v826_v47 = vsel %vm473_vm7, %v2376_v55, %v751_v16  ;;  %vm535_vm13 = vcmp.eq.s32.totalorder %v343_v12, 16  ;;  %vm599_vm14 = vcmp.eq.s32.totalorder %v343_v12, 17 }
  0xc9   : > { %v750_v28 = vsel %vm536_vm10, %v2388_v61, %v675_v11  ;;  %v901_v2 = vsel %vm409_vm6, %v2369_v53, %v826_v47  ;;  %v674_v37 = vsel %vm599_vm14, %v2399_v9, 0.0  ;;  %vm406_vm0 = vcmp.eq.s32.totalorder %v342_v27, 0 }
  0xca   : > { %v825_v20 = vsel %vm472_vm9, %v2379_v56, %v750_v28  ;;  %947 = vmatpush2.msra.mxu0 %v901_v2  ;;  %v749_v19 = vsel %vm535_vm13, %v2385_v60, %v674_v37  ;;  %vm470_vm1 = vcmp.eq.s32.totalorder %v342_v27, 1  ;;  %vm534_vm4 = vcmp.eq.s32.totalorder %v342_v27, 16 }
  0xcb   : > { %v900_v3 = vsel %vm408_vm8, %v2382_v57, %v825_v20  ;;  %v824_v15 = vsel %vm471_vm15, %v2376_v55, %v749_v19  ;;  %vm598_vm3 = vcmp.eq.s32.totalorder %v342_v27, 17  ;;  %v341_v59 = vsub.s32 %v2312_v42, %v2363_v51 }
  0xcc   : > { %948 = vmatprep.subr.mxu0 %v900_v3  ;;  %v340_v13 = vsub.s32 %v2315_v46, %v2366_v52  ;;  %v899_v45 = vsel %vm407_vm12, %v2369_v53, %v824_v15  ;;  %v673_v23 = vsel %vm598_vm3, %v2402_v63, 0.0  ;;  %v339_v21 = vsub.s32 %v2315_v46, %v2363_v51 }
  0xcd   : > { %v338_v29 = vsub.s32 %v2318_v48, %v2366_v52  ;;  %949 = vmatpush2.msra.mxu0 %v899_v45  ;;  %v748_v16 = vsel %vm534_vm4, %v2388_v61, %v673_v23  ;;  %vm405_vm6 = vcmp.eq.s32.totalorder %v341_v59, 0  ;;  %vm469_vm7 = vcmp.eq.s32.totalorder %v341_v59, 1 }
  0xce   : > { %vm533_vm2 = vcmp.eq.s32.totalorder %v341_v59, 16  ;;  %v823_v11 = vsel %vm470_vm1, %v2379_v56, %v748_v16  ;;  %vm597_vm5 = vcmp.eq.s32.totalorder %v341_v59, 17  ;;  %vm404_vm8 = vcmp.eq.s32.totalorder %v340_v13, 0 }
  0xcf   : > { %vm468_vm9 = vcmp.eq.s32.totalorder %v340_v13, 1  ;;  %v898_v12 = vsel %vm406_vm0, %v2382_v57, %v823_v11  ;;  %v672_v47 = vsel %vm597_vm5, %v2399_v9, 0.0  ;;  %vm532_vm10 = vcmp.eq.s32.totalorder %v340_v13, 16 }
  0xd0   : > { %vm596_vm11 = vcmp.eq.s32.totalorder %v340_v13, 17  ;;  %950 = vmatprep.subr.mxu0 %v898_v12  ;;  %v747_v28 = vsel %vm533_vm2, %v2385_v60, %v672_v47  ;;  %vm403_vm12 = vcmp.eq.s32.totalorder %v339_v21, 0  ;;  %vm467_vm15 = vcmp.eq.s32.totalorder %v339_v21, 1 }
  0xd1   : > { %v671_v2 = vsel %vm596_vm11, %v2402_v63, 0.0  ;;  %v822_v20 = vsel %vm469_vm7, %v2376_v55, %v747_v28  ;;  %vm531_vm13 = vcmp.eq.s32.totalorder %v339_v21, 16  ;;  %vm595_vm14 = vcmp.eq.s32.totalorder %v339_v21, 17 }
  0xd2   : > { %v746_v37 = vsel %vm532_vm10, %v2388_v61, %v671_v2  ;;  %v897_v27 = vsel %vm405_vm6, %v2369_v53, %v822_v20  ;;  %v670_v19 = vsel %vm595_vm14, %v2399_v9, 0.0  ;;  %vm402_vm0 = vcmp.eq.s32.totalorder %v338_v29, 0 }
  0xd3   : > { %v821_v3 = vsel %vm468_vm9, %v2379_v56, %v746_v37  ;;  %951 = vmatpush2.msra.mxu0 %v897_v27  ;;  %v745_v45 = vsel %vm531_vm13, %v2385_v60, %v670_v19  ;;  %vm466_vm1 = vcmp.eq.s32.totalorder %v338_v29, 1  ;;  %vm530_vm4 = vcmp.eq.s32.totalorder %v338_v29, 16 }
  0xd4   : > { %v896_v15 = vsel %vm404_vm8, %v2382_v57, %v821_v3  ;;  %v820_v23 = vsel %vm467_vm15, %v2376_v55, %v745_v45  ;;  %vm594_vm3 = vcmp.eq.s32.totalorder %v338_v29, 17  ;;  %v337_v59 = vsub.s32 %v2318_v48, %v2363_v51 }
  0xd5   : > { %952 = vmatprep.subr.mxu0 %v896_v15  ;;  %v336_v16 = vsub.s32 %v2321_v49, %v2366_v52  ;;  %v895_v11 = vsel %vm403_vm12, %v2369_v53, %v820_v23  ;;  %v669_v13 = vsel %vm594_vm3, %v2402_v63, 0.0  ;;  %v335_v12 = vsub.s32 %v2321_v49, %v2363_v51 }
  0xd6   : > { %v334_v47 = vsub.s32 %v2324_v50, %v2366_v52  ;;  %953 = vmatpush2.msra.mxu0 %v895_v11  ;;  %v744_v28 = vsel %vm530_vm4, %v2388_v61, %v669_v13  ;;  %vm401_vm6 = vcmp.eq.s32.totalorder %v337_v59, 0  ;;  %vm465_vm7 = vcmp.eq.s32.totalorder %v337_v59, 1 }
  0xd7   : > { %vm529_vm2 = vcmp.eq.s32.totalorder %v337_v59, 16  ;;  %v819_v2 = vsel %vm466_vm1, %v2379_v56, %v744_v28  ;;  %vm593_vm5 = vcmp.eq.s32.totalorder %v337_v59, 17  ;;  %vm400_vm8 = vcmp.eq.s32.totalorder %v336_v16, 0 }
  0xd8   : > { %vm464_vm9 = vcmp.eq.s32.totalorder %v336_v16, 1  ;;  %v894_v21 = vsel %vm402_vm0, %v2382_v57, %v819_v2  ;;  %v668_v20 = vsel %vm593_vm5, %v2399_v9, 0.0  ;;  %vm528_vm10 = vcmp.eq.s32.totalorder %v336_v16, 16 }
  0xd9   : > { %vm592_vm11 = vcmp.eq.s32.totalorder %v336_v16, 17  ;;  %954 = vmatprep.subr.mxu0 %v894_v21  ;;  %v743_v37 = vsel %vm529_vm2, %v2385_v60, %v668_v20  ;;  %vm399_vm12 = vcmp.eq.s32.totalorder %v335_v12, 0  ;;  %vm463_vm15 = vcmp.eq.s32.totalorder %v335_v12, 1 }
  0xda   : > { %v667_v27 = vsel %vm592_vm11, %v2402_v63, 0.0  ;;  %v818_v3 = vsel %vm465_vm7, %v2376_v55, %v743_v37  ;;  %vm527_vm13 = vcmp.eq.s32.totalorder %v335_v12, 16  ;;  %vm591_vm14 = vcmp.eq.s32.totalorder %v335_v12, 17 }
  0xdb   : > { %v742_v19 = vsel %vm528_vm10, %v2388_v61, %v667_v27  ;;  %v893_v29 = vsel %vm401_vm6, %v2369_v53, %v818_v3  ;;  %v666_v45 = vsel %vm591_vm14, %v2399_v9, 0.0  ;;  %vm398_vm0 = vcmp.eq.s32.totalorder %v334_v47, 0 }
  0xdc   : > { %v817_v15 = vsel %vm464_vm9, %v2379_v56, %v742_v19  ;;  %955 = vmatpush2.msra.mxu0 %v893_v29  ;;  %v741_v11 = vsel %vm527_vm13, %v2385_v60, %v666_v45  ;;  %vm462_vm1 = vcmp.eq.s32.totalorder %v334_v47, 1  ;;  %vm526_vm4 = vcmp.eq.s32.totalorder %v334_v47, 16 }
  0xdd   : > { %v892_v23 = vsel %vm400_vm8, %v2382_v57, %v817_v15  ;;  %v816_v13 = vsel %vm463_vm15, %v2376_v55, %v741_v11  ;;  %vm590_vm3 = vcmp.eq.s32.totalorder %v334_v47, 17  ;;  %v333_v59 = vsub.s32 %v2324_v50, %v2363_v51 }
  0xde   : > { %956 = vmatprep.subr.mxu0 %v892_v23  ;;  %v332_v28 = vsub.s32 %v2327_v58, %v2366_v52  ;;  %v891_v2 = vsel %vm399_vm12, %v2369_v53, %v816_v13  ;;  %v665_v16 = vsel %vm590_vm3, %v2402_v63, 0.0  ;;  %v331_v21 = vsub.s32 %v2327_v58, %v2363_v51 }
  0xdf   : > { %v2841_v20 = vadd.s32 168, %v2246_v1  ;;  %957 = vmatpush2.msra.mxu0 %v891_v2  ;;  %v740_v37 = vsel %vm526_vm4, %v2388_v61, %v665_v16  ;;  %vm397_vm6 = vcmp.eq.s32.totalorder %v333_v59, 0  ;;  %vm461_vm7 = vcmp.eq.s32.totalorder %v333_v59, 1 }
  0xe0   : > { %vm525_vm2 = vcmp.eq.s32.totalorder %v333_v59, 16  ;;  %v815_v27 = vsel %vm462_vm1, %v2379_v56, %v740_v37  ;;  %vm589_vm5 = vcmp.eq.s32.totalorder %v333_v59, 17  ;;  %vm396_vm8 = vcmp.eq.s32.totalorder %v332_v28, 0 }
  0xe1   : > { %vm460_vm9 = vcmp.eq.s32.totalorder %v332_v28, 1  ;;  %v890_v12 = vsel %vm398_vm0, %v2382_v57, %v815_v27  ;;  %v664_v3 = vsel %vm589_vm5, %v2399_v9, 0.0  ;;  %vm524_vm10 = vcmp.eq.s32.totalorder %v332_v28, 16 }
  0xe2   : > { %vm588_vm11 = vcmp.eq.s32.totalorder %v332_v28, 17  ;;  %958 = vmatprep.subr.mxu0 %v890_v12  ;;  %v739_v19 = vsel %vm525_vm2, %v2385_v60, %v664_v3  ;;  %vm395_vm12 = vcmp.eq.s32.totalorder %v331_v21, 0  ;;  %vm459_vm15 = vcmp.eq.s32.totalorder %v331_v21, 1 }
  0xe3   : > { %v663_v29 = vsel %vm588_vm11, %v2402_v63, 0.0  ;;  %v814_v15 = vsel %vm461_vm7, %v2376_v55, %v739_v19  ;;  %vm523_vm13 = vcmp.eq.s32.totalorder %v331_v21, 16  ;;  %vm587_vm14 = vcmp.eq.s32.totalorder %v331_v21, 17 }
  0xe4   : > { %v738_v45 = vsel %vm524_vm10, %v2388_v61, %v663_v29  ;;  %v889_v47 = vsel %vm397_vm6, %v2369_v53, %v814_v15  ;;  %v662_v11 = vsel %vm587_vm14, %v2399_v9, 0.0  ;;  %v330_v13 = vsub.s32 %v2841_v20, %v2366_v52 }
  0xe5   : > { %v813_v23 = vsel %vm460_vm9, %v2379_v56, %v738_v45  ;;  %959 = vmatpush2.msra.mxu0 %v889_v47  ;;  %v737_v16 = vsel %vm523_vm13, %v2385_v60, %v662_v11  ;;  %v329_v37 = vsub.s32 %v2841_v20, %v2363_v51  ;;  %v2865_v27 = vadd.s32 160, %v2246_v1 }
  0xe6   : > { %v888_v2 = vsel %vm396_vm8, %v2382_v57, %v813_v23  ;;  %v812_v59 = vsel %vm459_vm15, %v2376_v55, %v737_v16  ;;  %vm394_vm0 = vcmp.eq.s32.totalorder %v330_v13, 0  ;;  %vm458_vm1 = vcmp.eq.s32.totalorder %v330_v13, 1 }
  0xe7   : > { %960 = vmatprep.subr.mxu0 %v888_v2  ;;  %vm522_vm4 = vcmp.eq.s32.totalorder %v330_v13, 16  ;;  %v887_v12 = vsel %vm395_vm12, %v2369_v53, %v812_v59  ;;  %vm586_vm3 = vcmp.eq.s32.totalorder %v330_v13, 17  ;;  %vm393_vm6 = vcmp.eq.s32.totalorder %v329_v37, 0 }
  0xe8   : > { %vm457_vm7 = vcmp.eq.s32.totalorder %v329_v37, 1  ;;  %961 = vmatpush2.msra.mxu0 %v887_v12  ;;  %v661_v28 = vsel %vm586_vm3, %v2402_v63, 0.0  ;;  %vm521_vm2 = vcmp.eq.s32.totalorder %v329_v37, 16  ;;  %vm585_vm5 = vcmp.eq.s32.totalorder %v329_v37, 17 }
  0xe9   : > { %v328_v3 = vsub.s32 %v2865_v27, %v2366_v52  ;;  %v736_v19 = vsel %vm522_vm4, %v2388_v61, %v661_v28  ;;  %v660_v29 = vsel %vm585_vm5, %v2399_v9, 0.0  ;;  %v327_v15 = vsub.s32 %v2865_v27, %v2363_v51 }
  0xea   : > { %v2878_v21 = vadd.s32 152, %v2246_v1  ;;  %v811_v45 = vsel %vm458_vm1, %v2379_v56, %v736_v19  ;;  %v735_v47 = vsel %vm521_vm2, %v2385_v60, %v660_v29  ;;  %v2896_v19 = vadd.s32 144, %v2246_v1 }
  0xeb   : > { %vm392_vm8 = vcmp.eq.s32.totalorder %v328_v3, 0  ;;  %vm456_vm9 = vcmp.eq.s32.totalorder %v328_v3, 1  ;;  %v886_v23 = vsel %vm394_vm0, %v2382_v57, %v811_v45  ;;  %v810_v11 = vsel %vm457_vm7, %v2376_v55, %v735_v47 }
  0xec   : > { %vm520_vm10 = vcmp.eq.s32.totalorder %v328_v3, 16  ;;  %vm584_vm11 = vcmp.eq.s32.totalorder %v328_v3, 17  ;;  %962 = vmatprep.subr.mxu0 %v886_v23  ;;  %v885_v2 = vsel %vm393_vm6, %v2369_v53, %v810_v11  ;;  %vm391_vm12 = vcmp.eq.s32.totalorder %v327_v15, 0 }
  0xed   : > { %v659_v16 = vsel %vm584_vm11, %v2402_v63, 0.0  ;;  %vm455_vm15 = vcmp.eq.s32.totalorder %v327_v15, 1  ;;  %963 = vmatpush2.msra.mxu0 %v885_v2  ;;  %vm519_vm13 = vcmp.eq.s32.totalorder %v327_v15, 16  ;;  %vm583_vm14 = vcmp.eq.s32.totalorder %v327_v15, 17 }
  0xee   : > { %v734_v59 = vsel %vm520_vm10, %v2388_v61, %v659_v16  ;;  %v326_v13 = vsub.s32 %v2878_v21, %v2366_v52  ;;  %v658_v28 = vsel %vm583_vm14, %v2399_v9, 0.0  ;;  %v325_v37 = vsub.s32 %v2878_v21, %v2363_v51 }
  0xef   : > { %v809_v12 = vsel %vm456_vm9, %v2379_v56, %v734_v59  ;;  %v733_v45 = vsel %vm519_vm13, %v2385_v60, %v658_v28  ;;  %v324_v2 = vsub.s32 %v2896_v19, %v2366_v52  ;;  %v323_v16 = vsub.s32 %v2896_v19, %v2363_v51 }
  0xf0   : > { %v884_v29 = vsel %vm392_vm8, %v2382_v57, %v809_v12  ;;  %vm390_vm0 = vcmp.eq.s32.totalorder %v326_v13, 0  ;;  %vm454_vm1 = vcmp.eq.s32.totalorder %v326_v13, 1  ;;  %v808_v47 = vsel %vm455_vm15, %v2376_v55, %v733_v45 }
  0xf1   : > { %964 = vmatprep.subr.mxu0 %v884_v29  ;;  %vm518_vm4 = vcmp.eq.s32.totalorder %v326_v13, 16  ;;  %vm582_vm3 = vcmp.eq.s32.totalorder %v326_v13, 17  ;;  %vm389_vm6 = vcmp.eq.s32.totalorder %v325_v37, 0  ;;  %v883_v23 = vsel %vm391_vm12, %v2369_v53, %v808_v47 }
  0xf2   : > { %v657_v11 = vsel %vm582_vm3, %v2402_v63, 0.0  ;;  %vm453_vm7 = vcmp.eq.s32.totalorder %v325_v37, 1  ;;  %vm517_vm2 = vcmp.eq.s32.totalorder %v325_v37, 16  ;;  %965 = vmatpush2.msra.mxu0 %v883_v23  ;;  %vm581_vm5 = vcmp.eq.s32.totalorder %v325_v37, 17 }
  0xf3   : > { %v732_v3 = vsel %vm518_vm4, %v2388_v61, %v657_v11  ;;  %v656_v12 = vsel %vm581_vm5, %v2399_v9, 0.0  ;;  %v2913_v15 = vadd.s32 136, %v2246_v1  ;;  %v2916_v28 = vadd.s32 128, %v2246_v1 }
  0xf4   : > { %v807_v59 = vsel %vm454_vm1, %v2379_v56, %v732_v3  ;;  %v731_v45 = vsel %vm517_vm2, %v2385_v60, %v656_v12  ;;  %vm388_vm8 = vcmp.eq.s32.totalorder %v324_v2, 0  ;;  %vm452_vm9 = vcmp.eq.s32.totalorder %v324_v2, 1 }
  0xf5   : > { %v882_v29 = vsel %vm390_vm0, %v2382_v57, %v807_v59  ;;  %v806_v47 = vsel %vm453_vm7, %v2376_v55, %v731_v45  ;;  %vm516_vm10 = vcmp.eq.s32.totalorder %v324_v2, 16  ;;  %vm580_vm11 = vcmp.eq.s32.totalorder %v324_v2, 17 }
  0xf6   : > { %966 = vmatprep.subr.mxu0 %v882_v29  ;;  %vm387_vm12 = vcmp.eq.s32.totalorder %v323_v16, 0  ;;  %v881_v23 = vsel %vm389_vm6, %v2369_v53, %v806_v47  ;;  %v655_v11 = vsel %vm580_vm11, %v2402_v63, 0.0  ;;  %vm451_vm15 = vcmp.eq.s32.totalorder %v323_v16, 1 }
  0xf7   : > { %vm515_vm13 = vcmp.eq.s32.totalorder %v323_v16, 16  ;;  %967 = vmatpush2.msra.mxu0 %v881_v23  ;;  %v730_v13 = vsel %vm516_vm10, %v2388_v61, %v655_v11  ;;  %vm579_vm14 = vcmp.eq.s32.totalorder %v323_v16, 17  ;;  %v322_v3 = vsub.s32 %v2913_v15, %v2366_v52 }
  0xf8   : > { %v321_v59 = vsub.s32 %v2913_v15, %v2363_v51  ;;  %v805_v12 = vsel %vm452_vm9, %v2379_v56, %v730_v13  ;;  %v654_v29 = vsel %vm579_vm14, %v2399_v9, 0.0  ;;  %v320_v37 = vsub.s32 %v2916_v28, %v2366_v52 }
  0xf9   : > { %v319_v45 = vsub.s32 %v2916_v28, %v2363_v51  ;;  %v880_v47 = vsel %vm388_vm8, %v2382_v57, %v805_v12  ;;  %v729_v23 = vsel %vm515_vm13, %v2385_v60, %v654_v29  ;;  %vm386_vm0 = vcmp.eq.s32.totalorder %v322_v3, 0  ;;  %v231_v29 = vld [vmem:[%s163_s30] sm:$0xff] }
  0xfa   : > { %vm450_vm1 = vcmp.eq.s32.totalorder %v322_v3, 1  ;;  %968 = vmatprep.subr.mxu0 %v880_v47  ;;  %v804_v11 = vsel %vm451_vm15, %v2376_v55, %v729_v23  ;;  %vm514_vm4 = vcmp.eq.s32.totalorder %v322_v3, 16  ;;  %vm578_vm3 = vcmp.eq.s32.totalorder %v322_v3, 17 }
  0xfb   : > { %vm385_vm6 = vcmp.eq.s32.totalorder %v321_v59, 0  ;;  %v879_v52 = vsel %vm387_vm12, %v2369_v53, %v804_v11  ;;  %v653_v51 = vsel %vm578_vm3, %v2402_v63, 0.0  ;;  %vm449_vm7 = vcmp.eq.s32.totalorder %v321_v59, 1 }
  0xfc   : > { %vm513_vm2 = vcmp.eq.s32.totalorder %v321_v59, 16  ;;  %969 = vmatpush2.msra.mxu0 %v879_v52  ;;  %v728_v2 = vsel %vm514_vm4, %v2388_v61, %v653_v51  ;;  %vm577_vm5 = vcmp.eq.s32.totalorder %v321_v59, 17  ;;  %vm384_vm8 = vcmp.eq.s32.totalorder %v320_v37, 0 }
  0xfd   : > { %vm448_vm9 = vcmp.eq.s32.totalorder %v320_v37, 1  ;;  %v803_v13 = vsel %vm450_vm1, %v2379_v56, %v728_v2  ;;  %v652_v12 = vsel %vm577_vm5, %v2399_v9, 0.0  ;;  %vm512_vm10 = vcmp.eq.s32.totalorder %v320_v37, 16 }
  0xfe   : > { %vm576_vm11 = vcmp.eq.s32.totalorder %v320_v37, 17  ;;  %v878_v16 = vsel %vm386_vm0, %v2382_v57, %v803_v13  ;;  %v727_v47 = vsel %vm513_vm2, %v2385_v60, %v652_v12  ;;  %vm383_vm12 = vcmp.eq.s32.totalorder %v319_v45, 0 }
  0xff   : > { %v651_v23 = vsel %vm576_vm11, %v2402_v63, 0.0  ;;  %970 = vmatprep.subr.mxu0 %v878_v16  ;;  %v802_v11 = vsel %vm449_vm7, %v2376_v55, %v727_v47  ;;  %vm447_vm15 = vcmp.eq.s32.totalorder %v319_v45, 1  ;;  %vm511_vm13 = vcmp.eq.s32.totalorder %v319_v45, 16 }
 0x100   : > { %v726_v52 = vsel %vm512_vm10, %v2388_v61, %v651_v23  ;;  %v877_v51 = vsel %vm385_vm6, %v2369_v53, %v802_v11  ;;  %vm575_vm14 = vcmp.eq.s32.totalorder %v319_v45, 17  ;;  %v908_v2 = vcombine.high %v231_v29, %v231_v29 }
 0x101   : > { %v801_v3 = vsel %vm448_vm9, %v2379_v56, %v726_v52  ;;  %971 = vmatpush2.msra.mxu0 %v877_v51  ;;  %v650_v13 = vsel %vm575_vm14, %v2399_v9, 0.0  ;;  %v1074_v12 = vsub.s32 %v2255_v4, %v2449_v31  ;;  %v1073_v61 = vsub.s32 %v2255_v4, %v2446_v10 }
 0x102   : > { %v876_v63 = vsel %vm384_vm8, %v2382_v57, %v801_v3  ;;  %v725_v59 = vsel %vm511_vm13, %v2385_v60, %v650_v13  ;;  %974 = vmatprep.mubr.f32.mxu0 %v908_v2  ;;  %v1072_v56 = vsub.s32 %v2258_v5, %v2449_v31  ;;  %v1071_v16 = vsub.s32 %v2258_v5, %v2446_v10 }
 0x103   : > { %972 = vmatprep.subr.mxu0 %v876_v63  ;;  %v800_v57 = vsel %vm447_vm15, %v2376_v55, %v725_v59  ;;  %vm1138_vm0 = vcmp.eq.s32.totalorder %v1074_v12, 0  ;;  %vm1202_vm1 = vcmp.eq.s32.totalorder %v1074_v12, 1  ;;  %vm1266_vm4 = vcmp.eq.s32.totalorder %v1074_v12, 16 }
 0x104   : > { %v875_v9 = vsel %vm383_vm12, %v2369_v53, %v800_v57  ;;  %vm1330_vm3 = vcmp.eq.s32.totalorder %v1074_v12, 17  ;;  %vm1137_vm6 = vcmp.eq.s32.totalorder %v1073_v61, 0  ;;  %vm1201_vm7 = vcmp.eq.s32.totalorder %v1073_v61, 1 }
 0x105   : > { %973 = vmatpush2.msra.mxu0 %v875_v9  ;;  %v1405_v4 = vsel %vm1330_vm3, %v2479_v0, 0.0  ;;  %vm1265_vm2 = vcmp.eq.s32.totalorder %v1073_v61, 16  ;;  %vm1329_vm5 = vcmp.eq.s32.totalorder %v1073_v61, 17  ;;  %vm1136_vm8 = vcmp.eq.s32.totalorder %v1072_v56, 0 }
 0x106   : > { %975 = vmatmul.mubr.f32.vlgmr.msra.gmra.mxu0 %v231_v29  ;;  %v1480_v5 = vsel %vm1266_vm4, %v2471_v35, %v1405_v4  ;;  %v1404_v55 = vsel %vm1329_vm5, %v2476_v62, 0.0  ;;  %vm1200_vm9 = vcmp.eq.s32.totalorder %v1072_v56, 1  ;;  %vm1264_vm10 = vcmp.eq.s32.totalorder %v1072_v56, 16 }
 0x107   : > { %v1555_v60 = vsel %vm1202_vm1, %v2462_v43, %v1480_v5  ;;  %v1479_v53 = vsel %vm1265_vm2, %v2468_v54, %v1404_v55  ;;  %vm1328_vm11 = vcmp.eq.s32.totalorder %v1072_v56, 17  ;;  %vm1135_vm12 = vcmp.eq.s32.totalorder %v1071_v16, 0 }
 0x108   : > { %v1630_v37 = vsel %vm1138_vm0, %v2465_v44, %v1555_v60  ;;  %v1554_v45 = vsel %vm1201_vm7, %v2459_v39, %v1479_v53  ;;  %v1403_v29 = vsel %vm1328_vm11, %v2479_v0, 0.0  ;;  %vm1199_vm15 = vcmp.eq.s32.totalorder %v1071_v16, 1 }
 0x109   : > { %1666 = vmatprep.subr.mxu1 %v1630_v37  ;;  %v1629_v47 = vsel %vm1137_vm6, %v2452_v36, %v1554_v45  ;;  %v1478_v23 = vsel %vm1264_vm10, %v2471_v35, %v1403_v29  ;;  %vm1263_vm13 = vcmp.eq.s32.totalorder %v1071_v16, 16  ;;  %vm1327_vm14 = vcmp.eq.s32.totalorder %v1071_v16, 17 }
 0x10a   : > { %1667 = vmatpush1.msra.mxu1 %v1629_v47  ;;  %v1553_v11 = vsel %vm1200_vm9, %v2462_v43, %v1478_v23  ;;  %v1402_v52 = vsel %vm1327_vm14, %v2476_v62, 0.0  ;;  %v1070_v51 = vsub.s32 %v2261_v6, %v2449_v31  ;;  %v1069_v3 = vsub.s32 %v2261_v6, %v2446_v10 }
 0x10b   : > { %v1628_v2 = vsel %vm1136_vm8, %v2465_v44, %v1553_v11  ;;  %v1477_v63 = vsel %vm1263_vm13, %v2468_v54, %v1402_v52  ;;  %v1068_v13 = vsub.s32 %v2264_v7, %v2449_v31  ;;  %v1067_v12 = vsub.s32 %v2264_v7, %v2446_v10 }
 0x10c   : > { %1668 = vmatprep.subr.mxu1 %v1628_v2  ;;  %v1552_v61 = vsel %vm1199_vm15, %v2459_v39, %v1477_v63  ;;  %vm1134_vm0 = vcmp.eq.s32.totalorder %v1070_v51, 0  ;;  %vm1198_vm1 = vcmp.eq.s32.totalorder %v1070_v51, 1  ;;  %vm1262_vm4 = vcmp.eq.s32.totalorder %v1070_v51, 16 }
 0x10d   : > { %v1627_v6 = vsel %vm1135_vm12, %v2452_v36, %v1552_v61  ;;  %vm1326_vm3 = vcmp.eq.s32.totalorder %v1070_v51, 17  ;;  %vm1133_vm6 = vcmp.eq.s32.totalorder %v1069_v3, 0  ;;  %vm1197_vm7 = vcmp.eq.s32.totalorder %v1069_v3, 1 }
 0x10e   : > { %1669 = vmatpush1.msra.mxu1 %v1627_v6  ;;  %v1401_v59 = vsel %vm1326_vm3, %v2479_v0, 0.0  ;;  %vm1261_vm2 = vcmp.eq.s32.totalorder %v1069_v3, 16  ;;  %vm1325_vm5 = vcmp.eq.s32.totalorder %v1069_v3, 17  ;;  %vm1132_vm8 = vcmp.eq.s32.totalorder %v1068_v13, 0 }
 0x10f   : > { %v1476_v7 = vsel %vm1262_vm4, %v2471_v35, %v1401_v59  ;;  %v1400_v56 = vsel %vm1325_vm5, %v2476_v62, 0.0  ;;  %vm1196_vm9 = vcmp.eq.s32.totalorder %v1068_v13, 1  ;;  %vm1260_vm10 = vcmp.eq.s32.totalorder %v1068_v13, 16 }
 0x110   : > { %v1551_v57 = vsel %vm1198_vm1, %v2462_v43, %v1476_v7  ;;  %v1475_v16 = vsel %vm1261_vm2, %v2468_v54, %v1400_v56  ;;  %vm1324_vm11 = vcmp.eq.s32.totalorder %v1068_v13, 17  ;;  %vm1131_vm12 = vcmp.eq.s32.totalorder %v1067_v12, 0 }
 0x111   : > { %v1626_v9 = vsel %vm1134_vm0, %v2465_v44, %v1551_v57  ;;  %v1550_v4 = vsel %vm1197_vm7, %v2459_v39, %v1475_v16  ;;  %v1399_v5 = vsel %vm1324_vm11, %v2479_v0, 0.0  ;;  %vm1195_vm15 = vcmp.eq.s32.totalorder %v1067_v12, 1 }
 0x112   : > { %1670 = vmatprep.subr.mxu1 %v1626_v9  ;;  %v1625_v55 = vsel %vm1133_vm6, %v2452_v36, %v1550_v4  ;;  %v1474_v60 = vsel %vm1260_vm10, %v2471_v35, %v1399_v5  ;;  %vm1259_vm13 = vcmp.eq.s32.totalorder %v1067_v12, 16  ;;  %vm1323_vm14 = vcmp.eq.s32.totalorder %v1067_v12, 17 }
 0x113   : > { %1671 = vmatpush1.msra.mxu1 %v1625_v55  ;;  %v1549_v53 = vsel %vm1196_vm9, %v2462_v43, %v1474_v60  ;;  %v1398_v37 = vsel %vm1323_vm14, %v2476_v62, 0.0  ;;  %v1066_v45 = vsub.s32 %v2267_v8, %v2449_v31  ;;  %v1065_v29 = vsub.s32 %v2267_v8, %v2446_v10 }
 0x114   : > { %v1624_v47 = vsel %vm1132_vm8, %v2465_v44, %v1549_v53  ;;  %v1473_v23 = vsel %vm1259_vm13, %v2468_v54, %v1398_v37  ;;  %v1064_v11 = vsub.s32 %v2270_v14, %v2449_v31  ;;  %v1063_v52 = vsub.s32 %v2270_v14, %v2446_v10 }
 0x115   : > { %1672 = vmatprep.subr.mxu1 %v1624_v47  ;;  %v1548_v51 = vsel %vm1195_vm15, %v2459_v39, %v1473_v23  ;;  %vm1130_vm0 = vcmp.eq.s32.totalorder %v1066_v45, 0  ;;  %vm1194_vm1 = vcmp.eq.s32.totalorder %v1066_v45, 1  ;;  %vm1258_vm4 = vcmp.eq.s32.totalorder %v1066_v45, 16 }
 0x116   : > { %v1623_v8 = vsel %vm1131_vm12, %v2452_v36, %v1548_v51  ;;  %vm1322_vm3 = vcmp.eq.s32.totalorder %v1066_v45, 17  ;;  %vm1129_vm6 = vcmp.eq.s32.totalorder %v1065_v29, 0  ;;  %vm1193_vm7 = vcmp.eq.s32.totalorder %v1065_v29, 1 }
 0x117   : > { %1673 = vmatpush1.msra.mxu1 %v1623_v8  ;;  %v1397_v3 = vsel %vm1322_vm3, %v2479_v0, 0.0  ;;  %vm1257_vm2 = vcmp.eq.s32.totalorder %v1065_v29, 16  ;;  %vm1321_vm5 = vcmp.eq.s32.totalorder %v1065_v29, 17  ;;  %vm1128_vm8 = vcmp.eq.s32.totalorder %v1064_v11, 0 }
 0x118   : > { %v1472_v14 = vsel %vm1258_vm4, %v2471_v35, %v1397_v3  ;;  %v1396_v2 = vsel %vm1321_vm5, %v2476_v62, 0.0  ;;  %vm1192_vm9 = vcmp.eq.s32.totalorder %v1064_v11, 1  ;;  %vm1256_vm10 = vcmp.eq.s32.totalorder %v1064_v11, 16 }
 0x119   : > { %v1547_v63 = vsel %vm1194_vm1, %v2462_v43, %v1472_v14  ;;  %v1471_v13 = vsel %vm1257_vm2, %v2468_v54, %v1396_v2  ;;  %vm1320_vm11 = vcmp.eq.s32.totalorder %v1064_v11, 17  ;;  %vm1127_vm12 = vcmp.eq.s32.totalorder %v1063_v52, 0 }
 0x11a   : > { %v1622_v12 = vsel %vm1130_vm0, %v2465_v44, %v1547_v63  ;;  %v1546_v61 = vsel %vm1193_vm7, %v2459_v39, %v1471_v13  ;;  %v1395_v6 = vsel %vm1320_vm11, %v2479_v0, 0.0  ;;  %vm1191_vm15 = vcmp.eq.s32.totalorder %v1063_v52, 1 }
 0x11b   : > { %1674 = vmatprep.subr.mxu1 %v1622_v12  ;;  %v1621_v59 = vsel %vm1129_vm6, %v2452_v36, %v1546_v61  ;;  %v1470_v7 = vsel %vm1256_vm10, %v2471_v35, %v1395_v6  ;;  %vm1255_vm13 = vcmp.eq.s32.totalorder %v1063_v52, 16  ;;  %vm1319_vm14 = vcmp.eq.s32.totalorder %v1063_v52, 17 }
 0x11c   : > { %1675 = vmatpush1.msra.mxu1 %v1621_v59  ;;  %v1545_v56 = vsel %vm1192_vm9, %v2462_v43, %v1470_v7  ;;  %v1394_v57 = vsel %vm1319_vm14, %v2476_v62, 0.0  ;;  %v1062_v16 = vsub.s32 %v2273_v17, %v2449_v31  ;;  %v1061_v9 = vsub.s32 %v2273_v17, %v2446_v10 }
 0x11d   : > { %v1620_v4 = vsel %vm1128_vm8, %v2465_v44, %v1545_v56  ;;  %v1469_v5 = vsel %vm1255_vm13, %v2468_v54, %v1394_v57  ;;  %v1060_v55 = vsub.s32 %v2276_v18, %v2449_v31  ;;  %v1059_v60 = vsub.s32 %v2276_v18, %v2446_v10 }
 0x11e   : > { %1676 = vmatprep.subr.mxu1 %v1620_v4  ;;  %v1544_v53 = vsel %vm1191_vm15, %v2459_v39, %v1469_v5  ;;  %vm1126_vm0 = vcmp.eq.s32.totalorder %v1062_v16, 0  ;;  %vm1190_vm1 = vcmp.eq.s32.totalorder %v1062_v16, 1  ;;  %vm1254_vm4 = vcmp.eq.s32.totalorder %v1062_v16, 16 }
 0x11f   : > { %v1619_v17 = vsel %vm1127_vm12, %v2452_v36, %v1544_v53  ;;  %vm1318_vm3 = vcmp.eq.s32.totalorder %v1062_v16, 17  ;;  %vm1125_vm6 = vcmp.eq.s32.totalorder %v1061_v9, 0  ;;  %vm1189_vm7 = vcmp.eq.s32.totalorder %v1061_v9, 1 }
 0x120   : > { %1677 = vmatpush1.msra.mxu1 %v1619_v17  ;;  %v1393_v37 = vsel %vm1318_vm3, %v2479_v0, 0.0  ;;  %vm1253_vm2 = vcmp.eq.s32.totalorder %v1061_v9, 16  ;;  %vm1317_vm5 = vcmp.eq.s32.totalorder %v1061_v9, 17  ;;  %vm1124_vm8 = vcmp.eq.s32.totalorder %v1060_v55, 0 }
 0x121   : > { %v1468_v18 = vsel %vm1254_vm4, %v2471_v35, %v1393_v37  ;;  %v1392_v45 = vsel %vm1317_vm5, %v2476_v62, 0.0  ;;  %vm1188_vm9 = vcmp.eq.s32.totalorder %v1060_v55, 1  ;;  %vm1252_vm10 = vcmp.eq.s32.totalorder %v1060_v55, 16 }
 0x122   : > { %v1543_v29 = vsel %vm1190_vm1, %v2462_v43, %v1468_v18  ;;  %v1467_v47 = vsel %vm1253_vm2, %v2468_v54, %v1392_v45  ;;  %vm1316_vm11 = vcmp.eq.s32.totalorder %v1060_v55, 17  ;;  %vm1123_vm12 = vcmp.eq.s32.totalorder %v1059_v60, 0 }
 0x123   : > { %v1618_v23 = vsel %vm1126_vm0, %v2465_v44, %v1543_v29  ;;  %v1542_v11 = vsel %vm1189_vm7, %v2459_v39, %v1467_v47  ;;  %v1391_v52 = vsel %vm1316_vm11, %v2479_v0, 0.0  ;;  %vm1187_vm15 = vcmp.eq.s32.totalorder %v1059_v60, 1 }
 0x124   : > { %1678 = vmatprep.subr.mxu1 %v1618_v23  ;;  %v1617_v51 = vsel %vm1125_vm6, %v2452_v36, %v1542_v11  ;;  %v1466_v8 = vsel %vm1252_vm10, %v2471_v35, %v1391_v52  ;;  %vm1251_vm13 = vcmp.eq.s32.totalorder %v1059_v60, 16  ;;  %vm1315_vm14 = vcmp.eq.s32.totalorder %v1059_v60, 17 }
 0x125   : > { %1679 = vmatpush1.msra.mxu1 %v1617_v51  ;;  %v1541_v3 = vsel %vm1188_vm9, %v2462_v43, %v1466_v8  ;;  %v1390_v14 = vsel %vm1315_vm14, %v2476_v62, 0.0  ;;  %v1058_v2 = vsub.s32 %v2279_v22, %v2449_v31  ;;  %v1057_v63 = vsub.s32 %v2279_v22, %v2446_v10 }
 0x126   : > { %v1616_v13 = vsel %vm1124_vm8, %v2465_v44, %v1541_v3  ;;  %v1465_v12 = vsel %vm1251_vm13, %v2468_v54, %v1390_v14  ;;  %v1056_v61 = vsub.s32 %v2282_v24, %v2449_v31  ;;  %v1055_v6 = vsub.s32 %v2282_v24, %v2446_v10 }
 0x127   : > { %1680 = vmatprep.subr.mxu1 %v1616_v13  ;;  %v1540_v59 = vsel %vm1187_vm15, %v2459_v39, %v1465_v12  ;;  %vm1122_vm0 = vcmp.eq.s32.totalorder %v1058_v2, 0  ;;  %vm1186_vm1 = vcmp.eq.s32.totalorder %v1058_v2, 1  ;;  %vm1250_vm4 = vcmp.eq.s32.totalorder %v1058_v2, 16 }
 0x128   : > { %v1615_v22 = vsel %vm1123_vm12, %v2452_v36, %v1540_v59  ;;  %vm1314_vm3 = vcmp.eq.s32.totalorder %v1058_v2, 17  ;;  %vm1121_vm6 = vcmp.eq.s32.totalorder %v1057_v63, 0  ;;  %vm1185_vm7 = vcmp.eq.s32.totalorder %v1057_v63, 1 }
 0x129   : > { %1681 = vmatpush1.msra.mxu1 %v1615_v22  ;;  %v1389_v7 = vsel %vm1314_vm3, %v2479_v0, 0.0  ;;  %vm1249_vm2 = vcmp.eq.s32.totalorder %v1057_v63, 16  ;;  %vm1313_vm5 = vcmp.eq.s32.totalorder %v1057_v63, 17  ;;  %vm1120_vm8 = vcmp.eq.s32.totalorder %v1056_v61, 0 }
 0x12a   : > { %v1464_v24 = vsel %vm1250_vm4, %v2471_v35, %v1389_v7  ;;  %v1388_v56 = vsel %vm1313_vm5, %v2476_v62, 0.0  ;;  %vm1184_vm9 = vcmp.eq.s32.totalorder %v1056_v61, 1  ;;  %vm1248_vm10 = vcmp.eq.s32.totalorder %v1056_v61, 16 }
 0x12b   : > { %v1539_v57 = vsel %vm1186_vm1, %v2462_v43, %v1464_v24  ;;  %v1463_v16 = vsel %vm1249_vm2, %v2468_v54, %v1388_v56  ;;  %vm1312_vm11 = vcmp.eq.s32.totalorder %v1056_v61, 17  ;;  %vm1119_vm12 = vcmp.eq.s32.totalorder %v1055_v6, 0 }
 0x12c   : > { %v1614_v9 = vsel %vm1122_vm0, %v2465_v44, %v1539_v57  ;;  %v1538_v4 = vsel %vm1185_vm7, %v2459_v39, %v1463_v16  ;;  %v1387_v5 = vsel %vm1312_vm11, %v2479_v0, 0.0  ;;  %vm1183_vm15 = vcmp.eq.s32.totalorder %v1055_v6, 1 }
 0x12d   : > { %1682 = vmatprep.subr.mxu1 %v1614_v9  ;;  %v1613_v55 = vsel %vm1121_vm6, %v2452_v36, %v1538_v4  ;;  %v1462_v60 = vsel %vm1248_vm10, %v2471_v35, %v1387_v5  ;;  %vm1247_vm13 = vcmp.eq.s32.totalorder %v1055_v6, 16  ;;  %vm1311_vm14 = vcmp.eq.s32.totalorder %v1055_v6, 17 }
 0x12e   : > { %1683 = vmatpush1.msra.mxu1 %v1613_v55  ;;  %v1537_v53 = vsel %vm1184_vm9, %v2462_v43, %v1462_v60  ;;  %v1386_v17 = vsel %vm1311_vm14, %v2476_v62, 0.0  ;;  %v1054_v37 = vsub.s32 %v2285_v25, %v2449_v31  ;;  %v1053_v18 = vsub.s32 %v2285_v25, %v2446_v10 }
 0x12f   : > { %v1612_v45 = vsel %vm1120_vm8, %v2465_v44, %v1537_v53  ;;  %v1461_v29 = vsel %vm1247_vm13, %v2468_v54, %v1386_v17  ;;  %v1052_v47 = vsub.s32 %v2288_v26, %v2449_v31  ;;  %v1051_v23 = vsub.s32 %v2288_v26, %v2446_v10 }
 0x130   : > { %1684 = vmatprep.subr.mxu1 %v1612_v45  ;;  %v1536_v11 = vsel %vm1183_vm15, %v2459_v39, %v1461_v29  ;;  %vm1118_vm0 = vcmp.eq.s32.totalorder %v1054_v37, 0  ;;  %vm1182_vm1 = vcmp.eq.s32.totalorder %v1054_v37, 1  ;;  %vm1246_vm4 = vcmp.eq.s32.totalorder %v1054_v37, 16 }
 0x131   : > { %v1611_v25 = vsel %vm1119_vm12, %v2452_v36, %v1536_v11  ;;  %vm1310_vm3 = vcmp.eq.s32.totalorder %v1054_v37, 17  ;;  %vm1117_vm6 = vcmp.eq.s32.totalorder %v1053_v18, 0  ;;  %vm1181_vm7 = vcmp.eq.s32.totalorder %v1053_v18, 1 }
 0x132   : > { %1685 = vmatpush1.msra.mxu1 %v1611_v25  ;;  %v1385_v52 = vsel %vm1310_vm3, %v2479_v0, 0.0  ;;  %vm1245_vm2 = vcmp.eq.s32.totalorder %v1053_v18, 16  ;;  %vm1309_vm5 = vcmp.eq.s32.totalorder %v1053_v18, 17  ;;  %vm1116_vm8 = vcmp.eq.s32.totalorder %v1052_v47, 0 }
 0x133   : > { %v1460_v26 = vsel %vm1246_vm4, %v2471_v35, %v1385_v52  ;;  %v1384_v51 = vsel %vm1309_vm5, %v2476_v62, 0.0  ;;  %vm1180_vm9 = vcmp.eq.s32.totalorder %v1052_v47, 1  ;;  %vm1244_vm10 = vcmp.eq.s32.totalorder %v1052_v47, 16 }
 0x134   : > { %v1535_v8 = vsel %vm1182_vm1, %v2462_v43, %v1460_v26  ;;  %v1459_v3 = vsel %vm1245_vm2, %v2468_v54, %v1384_v51  ;;  %vm1308_vm11 = vcmp.eq.s32.totalorder %v1052_v47, 17  ;;  %vm1115_vm12 = vcmp.eq.s32.totalorder %v1051_v23, 0 }
 0x135   : > { %v1610_v14 = vsel %vm1118_vm0, %v2465_v44, %v1535_v8  ;;  %v1534_v2 = vsel %vm1181_vm7, %v2459_v39, %v1459_v3  ;;  %v1383_v63 = vsel %vm1308_vm11, %v2479_v0, 0.0  ;;  %vm1179_vm15 = vcmp.eq.s32.totalorder %v1051_v23, 1 }
 0x136   : > { %1686 = vmatprep.subr.mxu1 %v1610_v14  ;;  %v1609_v13 = vsel %vm1117_vm6, %v2452_v36, %v1534_v2  ;;  %v1458_v12 = vsel %vm1244_vm10, %v2471_v35, %v1383_v63  ;;  %vm1243_vm13 = vcmp.eq.s32.totalorder %v1051_v23, 16  ;;  %vm1307_vm14 = vcmp.eq.s32.totalorder %v1051_v23, 17 }
 0x137   : > { %1687 = vmatpush1.msra.mxu1 %v1609_v13  ;;  %v1533_v61 = vsel %vm1180_vm9, %v2462_v43, %v1458_v12  ;;  %v1382_v6 = vsel %vm1307_vm14, %v2476_v62, 0.0  ;;  %v1050_v59 = vsub.s32 %v2291_v30, %v2449_v31  ;;  %v1049_v22 = vsub.s32 %v2291_v30, %v2446_v10 }
 0x138   : > { %v1608_v7 = vsel %vm1116_vm8, %v2465_v44, %v1533_v61  ;;  %v1457_v24 = vsel %vm1243_vm13, %v2468_v54, %v1382_v6  ;;  %v1048_v56 = vsub.s32 %v2294_v32, %v2449_v31  ;;  %v1047_v57 = vsub.s32 %v2294_v32, %v2446_v10 }
 0x139   : > { %1688 = vmatprep.subr.mxu1 %v1608_v7  ;;  %v1532_v16 = vsel %vm1179_vm15, %v2459_v39, %v1457_v24  ;;  %vm1114_vm0 = vcmp.eq.s32.totalorder %v1050_v59, 0  ;;  %vm1178_vm1 = vcmp.eq.s32.totalorder %v1050_v59, 1  ;;  %vm1242_vm4 = vcmp.eq.s32.totalorder %v1050_v59, 16 }
 0x13a   : > { %v1607_v30 = vsel %vm1115_vm12, %v2452_v36, %v1532_v16  ;;  %vm1306_vm3 = vcmp.eq.s32.totalorder %v1050_v59, 17  ;;  %vm1113_vm6 = vcmp.eq.s32.totalorder %v1049_v22, 0  ;;  %vm1177_vm7 = vcmp.eq.s32.totalorder %v1049_v22, 1 }
 0x13b   : > { %1689 = vmatpush1.msra.mxu1 %v1607_v30  ;;  %v1381_v9 = vsel %vm1306_vm3, %v2479_v0, 0.0  ;;  %vm1241_vm2 = vcmp.eq.s32.totalorder %v1049_v22, 16  ;;  %vm1305_vm5 = vcmp.eq.s32.totalorder %v1049_v22, 17  ;;  %vm1112_vm8 = vcmp.eq.s32.totalorder %v1048_v56, 0 }
 0x13c   : > { %v1456_v32 = vsel %vm1242_vm4, %v2471_v35, %v1381_v9  ;;  %v1380_v4 = vsel %vm1305_vm5, %v2476_v62, 0.0  ;;  %vm1176_vm9 = vcmp.eq.s32.totalorder %v1048_v56, 1  ;;  %vm1240_vm10 = vcmp.eq.s32.totalorder %v1048_v56, 16 }
 0x13d   : > { %v1531_v5 = vsel %vm1178_vm1, %v2462_v43, %v1456_v32  ;;  %v1455_v55 = vsel %vm1241_vm2, %v2468_v54, %v1380_v4  ;;  %vm1304_vm11 = vcmp.eq.s32.totalorder %v1048_v56, 17  ;;  %vm1111_vm12 = vcmp.eq.s32.totalorder %v1047_v57, 0 }
 0x13e   : > { %v1606_v60 = vsel %vm1114_vm0, %v2465_v44, %v1531_v5  ;;  %v1530_v53 = vsel %vm1177_vm7, %v2459_v39, %v1455_v55  ;;  %v1379_v17 = vsel %vm1304_vm11, %v2479_v0, 0.0  ;;  %vm1175_vm15 = vcmp.eq.s32.totalorder %v1047_v57, 1 }
 0x13f   : > { %1690 = vmatprep.subr.mxu1 %v1606_v60  ;;  %v1605_v37 = vsel %vm1113_vm6, %v2452_v36, %v1530_v53  ;;  %v1454_v18 = vsel %vm1240_vm10, %v2471_v35, %v1379_v17  ;;  %vm1239_vm13 = vcmp.eq.s32.totalorder %v1047_v57, 16  ;;  %vm1303_vm14 = vcmp.eq.s32.totalorder %v1047_v57, 17 }
 0x140   : > { %1691 = vmatpush1.msra.mxu1 %v1605_v37  ;;  %v1529_v45 = vsel %vm1176_vm9, %v2462_v43, %v1454_v18  ;;  %v1378_v29 = vsel %vm1303_vm14, %v2476_v62, 0.0  ;;  %v1046_v47 = vsub.s32 %v2297_v33, %v2449_v31  ;;  %v1045_v23 = vsub.s32 %v2297_v33, %v2446_v10 }
 0x141   : > { %v1604_v11 = vsel %vm1112_vm8, %v2465_v44, %v1529_v45  ;;  %v1453_v25 = vsel %vm1239_vm13, %v2468_v54, %v1378_v29  ;;  %v1044_v52 = vsub.s32 %v2246_v1, %v2449_v31  ;;  %v1043_v26 = vsub.s32 %v2246_v1, %v2446_v10 }
 0x142   : > { %1692 = vmatprep.subr.mxu1 %v1604_v11  ;;  %v1528_v51 = vsel %vm1175_vm15, %v2459_v39, %v1453_v25  ;;  %vm1110_vm0 = vcmp.eq.s32.totalorder %v1046_v47, 0  ;;  %vm1174_vm1 = vcmp.eq.s32.totalorder %v1046_v47, 1  ;;  %vm1238_vm4 = vcmp.eq.s32.totalorder %v1046_v47, 16 }
 0x143   : > { %v1603_v33 = vsel %vm1111_vm12, %v2452_v36, %v1528_v51  ;;  %vm1302_vm3 = vcmp.eq.s32.totalorder %v1046_v47, 17  ;;  %vm1109_vm6 = vcmp.eq.s32.totalorder %v1045_v23, 0  ;;  %vm1173_vm7 = vcmp.eq.s32.totalorder %v1045_v23, 1 }
 0x144   : > { %1693 = vmatpush1.msra.mxu1 %v1603_v33  ;;  %v1377_v8 = vsel %vm1302_vm3, %v2479_v0, 0.0  ;;  %vm1237_vm2 = vcmp.eq.s32.totalorder %v1045_v23, 16  ;;  %vm1301_vm5 = vcmp.eq.s32.totalorder %v1045_v23, 17  ;;  %vm1108_vm8 = vcmp.eq.s32.totalorder %v1044_v52, 0 }
 0x145   : > { %v1452_v1 = vsel %vm1238_vm4, %v2471_v35, %v1377_v8  ;;  %v1376_v3 = vsel %vm1301_vm5, %v2476_v62, 0.0  ;;  %vm1172_vm9 = vcmp.eq.s32.totalorder %v1044_v52, 1  ;;  %vm1236_vm10 = vcmp.eq.s32.totalorder %v1044_v52, 16 }
 0x146   : > { %v1527_v14 = vsel %vm1174_vm1, %v2462_v43, %v1452_v1  ;;  %v1451_v2 = vsel %vm1237_vm2, %v2468_v54, %v1376_v3  ;;  %vm1300_vm11 = vcmp.eq.s32.totalorder %v1044_v52, 17  ;;  %vm1107_vm12 = vcmp.eq.s32.totalorder %v1043_v26, 0 }
 0x147   : > { %v1602_v63 = vsel %vm1110_vm0, %v2465_v44, %v1527_v14  ;;  %v1526_v13 = vsel %vm1173_vm7, %v2459_v39, %v1451_v2  ;;  %v1375_v12 = vsel %vm1300_vm11, %v2479_v0, 0.0  ;;  %vm1171_vm15 = vcmp.eq.s32.totalorder %v1043_v26, 1 }
 0x148   : > { %1694 = vmatprep.subr.mxu1 %v1602_v63  ;;  %v1601_v61 = vsel %vm1109_vm6, %v2452_v36, %v1526_v13  ;;  %v1450_v6 = vsel %vm1236_vm10, %v2471_v35, %v1375_v12  ;;  %vm1235_vm13 = vcmp.eq.s32.totalorder %v1043_v26, 16  ;;  %vm1299_vm14 = vcmp.eq.s32.totalorder %v1043_v26, 17 }
 0x149   : > { %1695 = vmatpush1.msra.mxu1 %v1601_v61  ;;  %v1525_v59 = vsel %vm1172_vm9, %v2462_v43, %v1450_v6  ;;  %v1374_v22 = vsel %vm1299_vm14, %v2476_v62, 0.0  ;;  %v1106_v7 = vsub.s32 %v2300_v34, %v2449_v31  ;;  %v1105_v24 = vsub.s32 %v2300_v34, %v2446_v10 }
 0x14a   : > { %v1600_v56 = vsel %vm1108_vm8, %v2465_v44, %v1525_v59  ;;  %v1449_v57 = vsel %vm1235_vm13, %v2468_v54, %v1374_v22  ;;  %v1104_v16 = vsub.s32 %v2303_v38, %v2449_v31  ;;  %v1103_v30 = vsub.s32 %v2303_v38, %v2446_v10 }
 0x14b   : > { %1696 = vmatprep.subr.mxu1 %v1600_v56  ;;  %v1524_v9 = vsel %vm1171_vm15, %v2459_v39, %v1449_v57  ;;  %vm1170_vm0 = vcmp.eq.s32.totalorder %v1106_v7, 0  ;;  %vm1234_vm1 = vcmp.eq.s32.totalorder %v1106_v7, 1  ;;  %vm1298_vm4 = vcmp.eq.s32.totalorder %v1106_v7, 16 }
 0x14c   : > { %v1599_v34 = vsel %vm1107_vm12, %v2452_v36, %v1524_v9  ;;  %vm1362_vm3 = vcmp.eq.s32.totalorder %v1106_v7, 17  ;;  %vm1169_vm6 = vcmp.eq.s32.totalorder %v1105_v24, 0  ;;  %vm1233_vm7 = vcmp.eq.s32.totalorder %v1105_v24, 1 }
 0x14d   : > { %1697 = vmatpush1.msra.mxu1 %v1599_v34  ;;  %v1437_v32 = vsel %vm1362_vm3, %v2479_v0, 0.0  ;;  %vm1297_vm2 = vcmp.eq.s32.totalorder %v1105_v24, 16  ;;  %vm1361_vm5 = vcmp.eq.s32.totalorder %v1105_v24, 17  ;;  %vm1168_vm8 = vcmp.eq.s32.totalorder %v1104_v16, 0 }
 0x14e   : > { %v1512_v38 = vsel %vm1298_vm4, %v2471_v35, %v1437_v32  ;;  %v1436_v4 = vsel %vm1361_vm5, %v2476_v62, 0.0  ;;  %vm1232_vm9 = vcmp.eq.s32.totalorder %v1104_v16, 1  ;;  %vm1296_vm10 = vcmp.eq.s32.totalorder %v1104_v16, 16 }
 0x14f   : > { %v1587_v5 = vsel %vm1234_vm1, %v2462_v43, %v1512_v38  ;;  %v1511_v55 = vsel %vm1297_vm2, %v2468_v54, %v1436_v4  ;;  %vm1360_vm11 = vcmp.eq.s32.totalorder %v1104_v16, 17  ;;  %vm1167_vm12 = vcmp.eq.s32.totalorder %v1103_v30, 0 }
 0x150   : > { %v1662_v60 = vsel %vm1170_vm0, %v2465_v44, %v1587_v5  ;;  %v1586_v53 = vsel %vm1233_vm7, %v2459_v39, %v1511_v55  ;;  %v1435_v17 = vsel %vm1360_vm11, %v2479_v0, 0.0  ;;  %vm1231_vm15 = vcmp.eq.s32.totalorder %v1103_v30, 1 }
 0x151   : > { %1698 = vmatprep.subr.mxu1 %v1662_v60  ;;  %v1661_v37 = vsel %vm1169_vm6, %v2452_v36, %v1586_v53  ;;  %v1510_v18 = vsel %vm1296_vm10, %v2471_v35, %v1435_v17  ;;  %vm1295_vm13 = vcmp.eq.s32.totalorder %v1103_v30, 16  ;;  %vm1359_vm14 = vcmp.eq.s32.totalorder %v1103_v30, 17 }
 0x152   : > { %1699 = vmatpush2.msra.mxu1 %v1661_v37  ;;  %v1585_v45 = vsel %vm1232_vm9, %v2462_v43, %v1510_v18  ;;  %v1434_v29 = vsel %vm1359_vm14, %v2476_v62, 0.0  ;;  %v1102_v47 = vsub.s32 %v2306_v40, %v2449_v31  ;;  %v1101_v23 = vsub.s32 %v2306_v40, %v2446_v10 }
 0x153   : > { %v1660_v11 = vsel %vm1168_vm8, %v2465_v44, %v1585_v45  ;;  %v1509_v25 = vsel %vm1295_vm13, %v2468_v54, %v1434_v29  ;;  %v1100_v52 = vsub.s32 %v2309_v41, %v2449_v31  ;;  %v1099_v26 = vsub.s32 %v2309_v41, %v2446_v10 }
 0x154   : > { %1700 = vmatprep.subr.mxu1 %v1660_v11  ;;  %v1584_v51 = vsel %vm1231_vm15, %v2459_v39, %v1509_v25  ;;  %vm1166_vm0 = vcmp.eq.s32.totalorder %v1102_v47, 0  ;;  %vm1230_vm1 = vcmp.eq.s32.totalorder %v1102_v47, 1  ;;  %vm1294_vm4 = vcmp.eq.s32.totalorder %v1102_v47, 16 }
 0x155   : > { %v1659_v40 = vsel %vm1167_vm12, %v2452_v36, %v1584_v51  ;;  %vm1358_vm3 = vcmp.eq.s32.totalorder %v1102_v47, 17  ;;  %vm1165_vm6 = vcmp.eq.s32.totalorder %v1101_v23, 0  ;;  %vm1229_vm7 = vcmp.eq.s32.totalorder %v1101_v23, 1 }
 0x156   : > { %1701 = vmatpush2.msra.mxu1 %v1659_v40  ;;  %v1433_v33 = vsel %vm1358_vm3, %v2479_v0, 0.0  ;;  %vm1293_vm2 = vcmp.eq.s32.totalorder %v1101_v23, 16  ;;  %vm1357_vm5 = vcmp.eq.s32.totalorder %v1101_v23, 17  ;;  %vm1164_vm8 = vcmp.eq.s32.totalorder %v1100_v52, 0 }
 0x157   : > { %v1508_v41 = vsel %vm1294_vm4, %v2471_v35, %v1433_v33  ;;  %v1432_v8 = vsel %vm1357_vm5, %v2476_v62, 0.0  ;;  %vm1228_vm9 = vcmp.eq.s32.totalorder %v1100_v52, 1  ;;  %vm1292_vm10 = vcmp.eq.s32.totalorder %v1100_v52, 16 }
 0x158   : > { %v1583_v1 = vsel %vm1230_vm1, %v2462_v43, %v1508_v41  ;;  %v1507_v3 = vsel %vm1293_vm2, %v2468_v54, %v1432_v8  ;;  %vm1356_vm11 = vcmp.eq.s32.totalorder %v1100_v52, 17  ;;  %vm1163_vm12 = vcmp.eq.s32.totalorder %v1099_v26, 0 }
 0x159   : > { %v1658_v14 = vsel %vm1166_vm0, %v2465_v44, %v1583_v1  ;;  %v1582_v2 = vsel %vm1229_vm7, %v2459_v39, %v1507_v3  ;;  %v1431_v63 = vsel %vm1356_vm11, %v2479_v0, 0.0  ;;  %vm1227_vm15 = vcmp.eq.s32.totalorder %v1099_v26, 1 }
 0x15a   : > { %1702 = vmatprep.subr.mxu1 %v1658_v14  ;;  %v1657_v13 = vsel %vm1165_vm6, %v2452_v36, %v1582_v2  ;;  %v1506_v12 = vsel %vm1292_vm10, %v2471_v35, %v1431_v63  ;;  %vm1291_vm13 = vcmp.eq.s32.totalorder %v1099_v26, 16  ;;  %vm1355_vm14 = vcmp.eq.s32.totalorder %v1099_v26, 17 }
 0x15b   : > { %1703 = vmatpush2.msra.mxu1 %v1657_v13  ;;  %v1581_v61 = vsel %vm1228_vm9, %v2462_v43, %v1506_v12  ;;  %v1430_v6 = vsel %vm1355_vm14, %v2476_v62, 0.0  ;;  %v1098_v59 = vsub.s32 %v2312_v42, %v2449_v31  ;;  %v1097_v22 = vsub.s32 %v2312_v42, %v2446_v10 }
 0x15c   : > { %v1656_v7 = vsel %vm1164_vm8, %v2465_v44, %v1581_v61  ;;  %v1505_v24 = vsel %vm1291_vm13, %v2468_v54, %v1430_v6  ;;  %v1096_v56 = vsub.s32 %v2315_v46, %v2449_v31  ;;  %v1095_v57 = vsub.s32 %v2315_v46, %v2446_v10 }
 0x15d   : > { %1704 = vmatprep.subr.mxu1 %v1656_v7  ;;  %v1580_v16 = vsel %vm1227_vm15, %v2459_v39, %v1505_v24  ;;  %vm1162_vm0 = vcmp.eq.s32.totalorder %v1098_v59, 0  ;;  %vm1226_vm1 = vcmp.eq.s32.totalorder %v1098_v59, 1  ;;  %vm1290_vm4 = vcmp.eq.s32.totalorder %v1098_v59, 16 }
 0x15e   : > { %v1655_v42 = vsel %vm1163_vm12, %v2452_v36, %v1580_v16  ;;  %vm1354_vm3 = vcmp.eq.s32.totalorder %v1098_v59, 17  ;;  %vm1161_vm6 = vcmp.eq.s32.totalorder %v1097_v22, 0  ;;  %vm1225_vm7 = vcmp.eq.s32.totalorder %v1097_v22, 1 }
 0x15f   : > { %1705 = vmatpush2.msra.mxu1 %v1655_v42  ;;  %v1429_v30 = vsel %vm1354_vm3, %v2479_v0, 0.0  ;;  %vm1289_vm2 = vcmp.eq.s32.totalorder %v1097_v22, 16  ;;  %vm1353_vm5 = vcmp.eq.s32.totalorder %v1097_v22, 17  ;;  %vm1160_vm8 = vcmp.eq.s32.totalorder %v1096_v56, 0 }
 0x160   : > { %v1504_v46 = vsel %vm1290_vm4, %v2471_v35, %v1429_v30  ;;  %v1428_v9 = vsel %vm1353_vm5, %v2476_v62, 0.0  ;;  %vm1224_vm9 = vcmp.eq.s32.totalorder %v1096_v56, 1  ;;  %vm1288_vm10 = vcmp.eq.s32.totalorder %v1096_v56, 16 }
 0x161   : > { %v1579_v34 = vsel %vm1226_vm1, %v2462_v43, %v1504_v46  ;;  %v1503_v32 = vsel %vm1289_vm2, %v2468_v54, %v1428_v9  ;;  %vm1352_vm11 = vcmp.eq.s32.totalorder %v1096_v56, 17  ;;  %vm1159_vm12 = vcmp.eq.s32.totalorder %v1095_v57, 0 }
 0x162   : > { %v1654_v38 = vsel %vm1162_vm0, %v2465_v44, %v1579_v34  ;;  %v1578_v4 = vsel %vm1225_vm7, %v2459_v39, %v1503_v32  ;;  %v1427_v5 = vsel %vm1352_vm11, %v2479_v0, 0.0  ;;  %vm1223_vm15 = vcmp.eq.s32.totalorder %v1095_v57, 1 }
 0x163   : > { %1706 = vmatprep.subr.mxu1 %v1654_v38  ;;  %v1653_v55 = vsel %vm1161_vm6, %v2452_v36, %v1578_v4  ;;  %v1502_v60 = vsel %vm1288_vm10, %v2471_v35, %v1427_v5  ;;  %vm1287_vm13 = vcmp.eq.s32.totalorder %v1095_v57, 16  ;;  %vm1351_vm14 = vcmp.eq.s32.totalorder %v1095_v57, 17 }
 0x164   : > { %1707 = vmatpush2.msra.mxu1 %v1653_v55  ;;  %v1577_v53 = vsel %vm1224_vm9, %v2462_v43, %v1502_v60  ;;  %v1426_v17 = vsel %vm1351_vm14, %v2476_v62, 0.0  ;;  %v1094_v37 = vsub.s32 %v2318_v48, %v2449_v31  ;;  %v1093_v18 = vsub.s32 %v2318_v48, %v2446_v10 }
 0x165   : > { %v1652_v45 = vsel %vm1160_vm8, %v2465_v44, %v1577_v53  ;;  %v1501_v29 = vsel %vm1287_vm13, %v2468_v54, %v1426_v17  ;;  %v1092_v47 = vsub.s32 %v2321_v49, %v2449_v31  ;;  %v1091_v23 = vsub.s32 %v2321_v49, %v2446_v10 }
 0x166   : > { %1708 = vmatprep.subr.mxu1 %v1652_v45  ;;  %v1576_v11 = vsel %vm1223_vm15, %v2459_v39, %v1501_v29  ;;  %vm1158_vm0 = vcmp.eq.s32.totalorder %v1094_v37, 0  ;;  %vm1222_vm1 = vcmp.eq.s32.totalorder %v1094_v37, 1  ;;  %vm1286_vm4 = vcmp.eq.s32.totalorder %v1094_v37, 16 }
 0x167   : > { %v1651_v48 = vsel %vm1159_vm12, %v2452_v36, %v1576_v11  ;;  %vm1350_vm3 = vcmp.eq.s32.totalorder %v1094_v37, 17  ;;  %vm1157_vm6 = vcmp.eq.s32.totalorder %v1093_v18, 0  ;;  %vm1221_vm7 = vcmp.eq.s32.totalorder %v1093_v18, 1 }
 0x168   : > { %1709 = vmatpush2.msra.mxu1 %v1651_v48  ;;  %v1425_v25 = vsel %vm1350_vm3, %v2479_v0, 0.0  ;;  %vm1285_vm2 = vcmp.eq.s32.totalorder %v1093_v18, 16  ;;  %vm1349_vm5 = vcmp.eq.s32.totalorder %v1093_v18, 17  ;;  %vm1156_vm8 = vcmp.eq.s32.totalorder %v1092_v47, 0 }
 0x169   : > { %v1500_v49 = vsel %vm1286_vm4, %v2471_v35, %v1425_v25  ;;  %v1424_v52 = vsel %vm1349_vm5, %v2476_v62, 0.0  ;;  %vm1220_vm9 = vcmp.eq.s32.totalorder %v1092_v47, 1  ;;  %vm1284_vm10 = vcmp.eq.s32.totalorder %v1092_v47, 16 }
 0x16a   : > { %v1575_v26 = vsel %vm1222_vm1, %v2462_v43, %v1500_v49  ;;  %v1499_v51 = vsel %vm1285_vm2, %v2468_v54, %v1424_v52  ;;  %vm1348_vm11 = vcmp.eq.s32.totalorder %v1092_v47, 17  ;;  %vm1155_vm12 = vcmp.eq.s32.totalorder %v1091_v23, 0 }
 0x16b   : > { %v1650_v40 = vsel %vm1158_vm0, %v2465_v44, %v1575_v26  ;;  %v1574_v33 = vsel %vm1221_vm7, %v2459_v39, %v1499_v51  ;;  %v1423_v41 = vsel %vm1348_vm11, %v2479_v0, 0.0  ;;  %vm1219_vm15 = vcmp.eq.s32.totalorder %v1091_v23, 1 }
 0x16c   : > { %1710 = vmatprep.subr.mxu1 %v1650_v40  ;;  %v1649_v8 = vsel %vm1157_vm6, %v2452_v36, %v1574_v33  ;;  %v1498_v1 = vsel %vm1284_vm10, %v2471_v35, %v1423_v41  ;;  %vm1283_vm13 = vcmp.eq.s32.totalorder %v1091_v23, 16  ;;  %vm1347_vm14 = vcmp.eq.s32.totalorder %v1091_v23, 17 }
 0x16d   : > { %1711 = vmatpush2.msra.mxu1 %v1649_v8  ;;  %v1573_v3 = vsel %vm1220_vm9, %v2462_v43, %v1498_v1  ;;  %v1422_v14 = vsel %vm1347_vm14, %v2476_v62, 0.0  ;;  %v1090_v2 = vsub.s32 %v2324_v50, %v2449_v31  ;;  %v1089_v63 = vsub.s32 %v2324_v50, %v2446_v10 }
 0x16e   : > { %v1648_v13 = vsel %vm1156_vm8, %v2465_v44, %v1573_v3  ;;  %v1497_v12 = vsel %vm1283_vm13, %v2468_v54, %v1422_v14  ;;  %v1088_v61 = vsub.s32 %v2327_v58, %v2449_v31  ;;  %v1087_v6 = vsub.s32 %v2327_v58, %v2446_v10 }
 0x16f   : > { %1712 = vmatprep.subr.mxu1 %v1648_v13  ;;  %v1572_v59 = vsel %vm1219_vm15, %v2459_v39, %v1497_v12  ;;  %vm1154_vm0 = vcmp.eq.s32.totalorder %v1090_v2, 0  ;;  %vm1218_vm1 = vcmp.eq.s32.totalorder %v1090_v2, 1  ;;  %vm1282_vm4 = vcmp.eq.s32.totalorder %v1090_v2, 16 }
 0x170   : > { %v1647_v50 = vsel %vm1155_vm12, %v2452_v36, %v1572_v59  ;;  %vm1346_vm3 = vcmp.eq.s32.totalorder %v1090_v2, 17  ;;  %vm1153_vm6 = vcmp.eq.s32.totalorder %v1089_v63, 0  ;;  %vm1217_vm7 = vcmp.eq.s32.totalorder %v1089_v63, 1 }
 0x171   : > { %1713 = vmatpush2.msra.mxu1 %v1647_v50  ;;  %v1421_v22 = vsel %vm1346_vm3, %v2479_v0, 0.0  ;;  %vm1281_vm2 = vcmp.eq.s32.totalorder %v1089_v63, 16  ;;  %vm1345_vm5 = vcmp.eq.s32.totalorder %v1089_v63, 17  ;;  %vm1152_vm8 = vcmp.eq.s32.totalorder %v1088_v61, 0 }
 0x172   : > { %v1496_v58 = vsel %vm1282_vm4, %v2471_v35, %v1421_v22  ;;  %v1420_v7 = vsel %vm1345_vm5, %v2476_v62, 0.0  ;;  %vm1216_vm9 = vcmp.eq.s32.totalorder %v1088_v61, 1  ;;  %vm1280_vm10 = vcmp.eq.s32.totalorder %v1088_v61, 16 }
 0x173   : > { %v1571_v24 = vsel %vm1218_vm1, %v2462_v43, %v1496_v58  ;;  %v1495_v56 = vsel %vm1281_vm2, %v2468_v54, %v1420_v7  ;;  %vm1344_vm11 = vcmp.eq.s32.totalorder %v1088_v61, 17  ;;  %vm1151_vm12 = vcmp.eq.s32.totalorder %v1087_v6, 0 }
 0x174   : > { %v1646_v57 = vsel %vm1154_vm0, %v2465_v44, %v1571_v24  ;;  %v1570_v16 = vsel %vm1217_vm7, %v2459_v39, %v1495_v56  ;;  %v1419_v42 = vsel %vm1344_vm11, %v2479_v0, 0.0  ;;  %vm1215_vm15 = vcmp.eq.s32.totalorder %v1087_v6, 1 }
 0x175   : > { %1714 = vmatprep.subr.mxu1 %v1646_v57  ;;  %v1645_v30 = vsel %vm1153_vm6, %v2452_v36, %v1570_v16  ;;  %v1494_v46 = vsel %vm1280_vm10, %v2471_v35, %v1419_v42  ;;  %vm1279_vm13 = vcmp.eq.s32.totalorder %v1087_v6, 16  ;;  %vm1343_vm14 = vcmp.eq.s32.totalorder %v1087_v6, 17 }
 0x176   : > { %1715 = vmatpush2.msra.mxu1 %v1645_v30  ;;  %v1569_v9 = vsel %vm1216_vm9, %v2462_v43, %v1494_v46  ;;  %v1418_v34 = vsel %vm1343_vm14, %v2476_v62, 0.0  ;;  %v1086_v32 = vsub.s32 %v2841_v20, %v2449_v31  ;;  %v1085_v38 = vsub.s32 %v2841_v20, %v2446_v10 }
 0x177   : > { %v1644_v4 = vsel %vm1152_vm8, %v2465_v44, %v1569_v9  ;;  %v1493_v5 = vsel %vm1279_vm13, %v2468_v54, %v1418_v34  ;;  %v1084_v55 = vsub.s32 %v2865_v27, %v2449_v31  ;;  %v1083_v60 = vsub.s32 %v2865_v27, %v2446_v10 }
 0x178   : > { %1716 = vmatprep.subr.mxu1 %v1644_v4  ;;  %v1568_v53 = vsel %vm1215_vm15, %v2459_v39, %v1493_v5  ;;  %vm1150_vm0 = vcmp.eq.s32.totalorder %v1086_v32, 0  ;;  %vm1214_vm1 = vcmp.eq.s32.totalorder %v1086_v32, 1  ;;  %vm1278_vm4 = vcmp.eq.s32.totalorder %v1086_v32, 16 }
 0x179   : > { %v1643_v20 = vsel %vm1151_vm12, %v2452_v36, %v1568_v53  ;;  %vm1342_vm3 = vcmp.eq.s32.totalorder %v1086_v32, 17  ;;  %vm1149_vm6 = vcmp.eq.s32.totalorder %v1085_v38, 0  ;;  %vm1213_vm7 = vcmp.eq.s32.totalorder %v1085_v38, 1 }
 0x17a   : > { %1717 = vmatpush2.msra.mxu1 %v1643_v20  ;;  %v1417_v17 = vsel %vm1342_vm3, %v2479_v0, 0.0  ;;  %vm1277_vm2 = vcmp.eq.s32.totalorder %v1085_v38, 16  ;;  %vm1341_vm5 = vcmp.eq.s32.totalorder %v1085_v38, 17  ;;  %vm1148_vm8 = vcmp.eq.s32.totalorder %v1084_v55, 0 }
 0x17b   : > { %v1492_v27 = vsel %vm1278_vm4, %v2471_v35, %v1417_v17  ;;  %v1416_v37 = vsel %vm1341_vm5, %v2476_v62, 0.0  ;;  %vm1212_vm9 = vcmp.eq.s32.totalorder %v1084_v55, 1  ;;  %vm1276_vm10 = vcmp.eq.s32.totalorder %v1084_v55, 16 }
 0x17c   : > { %v1567_v18 = vsel %vm1214_vm1, %v2462_v43, %v1492_v27  ;;  %v1491_v45 = vsel %vm1277_vm2, %v2468_v54, %v1416_v37  ;;  %vm1340_vm11 = vcmp.eq.s32.totalorder %v1084_v55, 17  ;;  %vm1147_vm12 = vcmp.eq.s32.totalorder %v1083_v60, 0 }
 0x17d   : > { %v1642_v29 = vsel %vm1150_vm0, %v2465_v44, %v1567_v18  ;;  %v1566_v47 = vsel %vm1213_vm7, %v2459_v39, %v1491_v45  ;;  %v1415_v23 = vsel %vm1340_vm11, %v2479_v0, 0.0  ;;  %vm1211_vm15 = vcmp.eq.s32.totalorder %v1083_v60, 1 }
 0x17e   : > { %1718 = vmatprep.subr.mxu1 %v1642_v29  ;;  %v1641_v11 = vsel %vm1149_vm6, %v2452_v36, %v1566_v47  ;;  %v1490_v48 = vsel %vm1276_vm10, %v2471_v35, %v1415_v23  ;;  %vm1275_vm13 = vcmp.eq.s32.totalorder %v1083_v60, 16  ;;  %vm1339_vm14 = vcmp.eq.s32.totalorder %v1083_v60, 17 }
 0x17f   : > { %1719 = vmatpush2.msra.mxu1 %v1641_v11  ;;  %v1565_v25 = vsel %vm1212_vm9, %v2462_v43, %v1490_v48  ;;  %v1414_v49 = vsel %vm1339_vm14, %v2476_v62, 0.0  ;;  %v1082_v52 = vsub.s32 %v2878_v21, %v2449_v31  ;;  %v1081_v26 = vsub.s32 %v2878_v21, %v2446_v10 }
 0x180   : > { %v1640_v51 = vsel %vm1148_vm8, %v2465_v44, %v1565_v25  ;;  %v1489_v40 = vsel %vm1275_vm13, %v2468_v54, %v1414_v49  ;;  %v1080_v33 = vsub.s32 %v2896_v19, %v2449_v31  ;;  %v1079_v41 = vsub.s32 %v2896_v19, %v2446_v10 }
 0x181   : > { %1720 = vmatprep.subr.mxu1 %v1640_v51  ;;  %v1564_v8 = vsel %vm1211_vm15, %v2459_v39, %v1489_v40  ;;  %vm1146_vm0 = vcmp.eq.s32.totalorder %v1082_v52, 0  ;;  %vm1210_vm1 = vcmp.eq.s32.totalorder %v1082_v52, 1  ;;  %vm1274_vm4 = vcmp.eq.s32.totalorder %v1082_v52, 16 }
 0x182   : > { %v1639_v21 = vsel %vm1147_vm12, %v2452_v36, %v1564_v8  ;;  %vm1338_vm3 = vcmp.eq.s32.totalorder %v1082_v52, 17  ;;  %vm1145_vm6 = vcmp.eq.s32.totalorder %v1081_v26, 0  ;;  %vm1209_vm7 = vcmp.eq.s32.totalorder %v1081_v26, 1 }
 0x183   : > { %1721 = vmatpush2.msra.mxu1 %v1639_v21  ;;  %v1413_v1 = vsel %vm1338_vm3, %v2479_v0, 0.0  ;;  %vm1273_vm2 = vcmp.eq.s32.totalorder %v1081_v26, 16  ;;  %vm1337_vm5 = vcmp.eq.s32.totalorder %v1081_v26, 17  ;;  %vm1144_vm8 = vcmp.eq.s32.totalorder %v1080_v33, 0 }
 0x184   : > { %v1488_v19 = vsel %vm1274_vm4, %v2471_v35, %v1413_v1  ;;  %v1412_v3 = vsel %vm1337_vm5, %v2476_v62, 0.0  ;;  %vm1208_vm9 = vcmp.eq.s32.totalorder %v1080_v33, 1  ;;  %vm1272_vm10 = vcmp.eq.s32.totalorder %v1080_v33, 16 }
 0x185   : > { %v1563_v14 = vsel %vm1210_vm1, %v2462_v43, %v1488_v19  ;;  %v1487_v2 = vsel %vm1273_vm2, %v2468_v54, %v1412_v3  ;;  %vm1336_vm11 = vcmp.eq.s32.totalorder %v1080_v33, 17  ;;  %vm1143_vm12 = vcmp.eq.s32.totalorder %v1079_v41, 0 }
 0x186   : > { %v1638_v63 = vsel %vm1146_vm0, %v2465_v44, %v1563_v14  ;;  %v1562_v13 = vsel %vm1209_vm7, %v2459_v39, %v1487_v2  ;;  %v1411_v12 = vsel %vm1336_vm11, %v2479_v0, 0.0  ;;  %vm1207_vm15 = vcmp.eq.s32.totalorder %v1079_v41, 1 }
 0x187   : > { %1722 = vmatprep.subr.mxu1 %v1638_v63  ;;  %v1637_v61 = vsel %vm1145_vm6, %v2452_v36, %v1562_v13  ;;  %v1486_v6 = vsel %vm1272_vm10, %v2471_v35, %v1411_v12  ;;  %vm1271_vm13 = vcmp.eq.s32.totalorder %v1079_v41, 16  ;;  %vm1335_vm14 = vcmp.eq.s32.totalorder %v1079_v41, 17 }
 0x188   : > { %1723 = vmatpush2.msra.mxu1 %v1637_v61  ;;  %v1561_v59 = vsel %vm1208_vm9, %v2462_v43, %v1486_v6  ;;  %v1410_v50 = vsel %vm1335_vm14, %v2476_v62, 0.0  ;;  %v1078_v22 = vsub.s32 %v2913_v15, %v2449_v31  ;;  %v1077_v58 = vsub.s32 %v2913_v15, %v2446_v10 }
 0x189   : > { %v1636_v7 = vsel %vm1144_vm8, %v2465_v44, %v1561_v59  ;;  %v1485_v24 = vsel %vm1271_vm13, %v2468_v54, %v1410_v50  ;;  %v1076_v56 = vsub.s32 %v2916_v28, %v2449_v31  ;;  %v1075_v16 = vsub.s32 %v2916_v28, %v2446_v10 }
 0x18a   : > { %1724 = vmatprep.subr.mxu1 %v1636_v7  ;;  %v1560_v57 = vsel %vm1207_vm15, %v2459_v39, %v1485_v24  ;;  %vm1142_vm0 = vcmp.eq.s32.totalorder %v1078_v22, 0  ;;  %vm1270_vm1 = vcmp.eq.s32.totalorder %v1078_v22, 16  ;;  %vm1206_vm4 = vcmp.eq.s32.totalorder %v1078_v22, 1 }
 0x18b   : > { %v1635_v42 = vsel %vm1143_vm12, %v2452_v36, %v1560_v57  ;;  %vm1334_vm3 = vcmp.eq.s32.totalorder %v1078_v22, 17  ;;  %vm1141_vm6 = vcmp.eq.s32.totalorder %v1077_v58, 0  ;;  %vm1205_vm7 = vcmp.eq.s32.totalorder %v1077_v58, 1 }
 0x18c   : > { %1725 = vmatpush2.msra.mxu1 %v1635_v42  ;;  %v1409_v15 = vsel %vm1334_vm3, %v2479_v0, 0.0  ;;  %vm1269_vm2 = vcmp.eq.s32.totalorder %v1077_v58, 16  ;;  %vm1333_vm5 = vcmp.eq.s32.totalorder %v1077_v58, 17  ;;  %vm1140_vm8 = vcmp.eq.s32.totalorder %v1076_v56, 0 }
 0x18d   : > { %v1484_v31 = vsel %vm1270_vm1, %v2471_v35, %v1409_v15  ;;  %v1408_v30 = vsel %vm1333_vm5, %v2476_v62, 0.0  ;;  %vm1268_vm9 = vcmp.eq.s32.totalorder %v1076_v56, 16  ;;  %vm1204_vm10 = vcmp.eq.s32.totalorder %v1076_v56, 1 }
 0x18e   : > { %v1559_v10 = vsel %vm1206_vm4, %v2462_v43, %v1484_v31  ;;  %v1483_v28 = vsel %vm1269_vm2, %v2468_v54, %v1408_v30  ;;  %vm1332_vm11 = vcmp.eq.s32.totalorder %v1076_v56, 17  ;;  %vm1203_vm12 = vcmp.eq.s32.totalorder %v1075_v16, 1 }
 0x18f   : > { %v1634_v46 = vsel %vm1142_vm0, %v2465_v44, %v1559_v10  ;;  %v1558_v9 = vsel %vm1205_vm7, %v2459_v39, %v1483_v28  ;;  %v1407_v34 = vsel %vm1332_vm11, %v2479_v0, 0.0  ;;  %vm1267_vm15 = vcmp.eq.s32.totalorder %v1075_v16, 16 }
 0x190   : > { %1726 = vmatprep.subr.mxu1 %v1634_v46  ;;  %v1633_v32 = vsel %vm1141_vm6, %v2452_v36, %v1558_v9  ;;  %v1482_v38 = vsel %vm1268_vm9, %v2471_v35, %v1407_v34  ;;  %vm1331_vm13 = vcmp.eq.s32.totalorder %v1075_v16, 17  ;;  %vm1139_vm14 = vcmp.eq.s32.totalorder %v1075_v16, 0 }
 0x191   : > { %1727 = vmatpush2.msra.mxu1 %v1633_v32  ;;  %v1557_v4 = vsel %vm1204_vm10, %v2462_v43, %v1482_v38  ;;  %v1406_v5 = vsel %vm1331_vm13, %v2476_v62, 0.0 }
 0x192   : > { %v1632_v0 = vsel %vm1140_vm8, %v2465_v44, %v1557_v4  ;;  %v1481_v55 = vsel %vm1267_vm15, %v2468_v54, %v1406_v5 }
 0x193   : > { %1728 = vmatprep.subr.mxu1 %v1632_v0  ;;  %v1556_v60 = vsel %vm1203_vm12, %v2459_v39, %v1481_v55 }
 0x194   : > { %v1631_v35 = vsel %vm1139_vm14, %v2452_v36, %v1556_v60 }
 0x195   : > { %1729 = vmatpush2.msra.mxu1 %v1631_v35 }
 0x1c6   : > { %v976_v53 = vpop.f32.mrf.mxu0 }
 0x1c8   : > { %v978_v20 = vpop.f32.mrf.mxu0 }
 0x1c9   : > { %v983_v43 = vcombine.low %v976_v53, %v978_v20  ;;  %v1878_v17 = vcombine.low %v978_v20, %v978_v20 }
 0x1cb   : > { %1730 = vmatprep.mubr.f32.mxu1 %v1878_v17 }
 0x1cc   : > { %1731 = vmatmul.mubr.f32.vlgmr.msra.gmra.mxu1 %v983_v43 }
 0x28c   : > { %v1732_v62 = vpop.f32.mrf.mxu1 }
 0x28e   : > { %v1734_v44 = vpop.f32.mrf.mxu1 }
 0x28f   : > { %v1739_v54 = vcombine.low %v1732_v62, %v1734_v44 }
 0x291   : > { %1741 = vst [vmem:[%s197_s7] sm:$0xff] %v1739_v54 }
 0x292   : > { %2008 = shalt.err (!%p2005_p5)
}
 0x293   : > { %s2009_s23 = scalar_lea.hbm %s1755_s16, 128  ;;  %s2013_s5 = scalar_lea.hbm %s3485_s2, 256 }
 0x294   : > { %p2010_p9 = scmp.ne.s32.totalorder %s1755_s16, %s2009_s23  ;;  %p2014_p12 = scmp.lt.s32.totalorder %s1755_s16, %s3485_s2 }
 0x295   : > { %p2015_p1 = scmp.lt.s32.totalorder %s2013_s5, %s2009_s23 }
 0x296   : > { %p2011_p0 = pnand %p2010_p9, %p3514_p3 }
 0x297   : > { %p2016_p6 = por %p2015_p1, %p2014_p12 }
 0x298   : > { %p2012_p11 = pneg %p2011_p0 }
 0x29a   : > { %p2017_p13 = pnand %p2016_p6, %p2012_p11 }
 0x29c   : > { %2020 = shalt.err (!%p2017_p13)
}
 0x29d   : > { %1891 = dma.vmem_to_hbm [thread:$0]  (%p3514_p3), %s1758_s14, 128, %s1755_s16, %s1743_s17  }
 0x29e PF: > { %s1769_s30 = sand.u32 1, %s2051_s9   ;;  %p3515_p7 = scmp.ne.s32.totalorder %s3491_s22, 0 }
 0x29f   : > { %p3516_p8 = scmp.ge.s32.totalorder %s2063_s12, 2  ;;  %s1770_s3 = scalar_lea.sflag [#allocation5], %s1769_s30 }
 0x2a1   : > { %p1901_p10 = pnand %p3516_p8, %p3515_p7 }
 0x2a3   : > { %p1902_p2 = pneg %p1901_p10 }
 0x2a5   : > { %2046 = dma.done.wait (%p1902_p2), %s1770_s3, 128  }
 0x2a6   : > { %2048 = vsyncadd (%p1902_p2), %s1770_s3, 4294967168  ;;  %p18_p4 = scmp.ge.s32.totalorder %s2108_s15, 4   ;;  %s3517_s9 = smov %s2055_s10 }
 0x2a7   : > { %s3518_s10 = smov %s2059_s11  ;;  %s3519_s11 = smov %s2120_s18 }
 0x2a8   : > { %s3520_s12 = smov %s2108_s15  ;;  %20 = sbr.rel (!%p18_p4) target bundleno = 7 (0x7), region = 89 }
 0x2ad   :  { %1775 = vsyncpa [#allocation4], 1 }
 0x2ae   :  { %1777 = vsyncpa [#allocation4 + $0x1], 1 }
 0x2af   :  { %1778 = vsyncpa [#allocation7], 1 }
 0x2b0   :  { %1780 = vsyncpa [#allocation7 + $0x1], 1 }
 0x2b1   :  { %1781 = vsyncpa [#allocation5], 1 }
 0x2b2   :  { %1783 = vsyncpa [#allocation5 + $0x1], 1 }

</bundles_post_ra>
